<compile_context>
chip_gen: v6e
topology: v6e:2x2x1
jax: 0.10.0
libtpu: 0.0.40
codegen_flags: <defaults>
</compile_context>

<pallas_src>
import functools
import math

import numpy as np
import jax
import jax.numpy as jnp
from jax.experimental import pallas as pl
from jax.experimental.pallas import tpu as pltpu

_LN_EPS = 1e-6
_NEG_BIG = -1.0e9
_VMEM_LIMIT = 64 * 1024 * 1024

_CONTRACT_NT = (((1,), (1,)), ((), ()))   # (M,K) x (N,K) -> (M,N)
_CONTRACT_NN = (((1,), (0,)), ((), ()))   # (M,K) x (K,N) -> (M,N)


# ----------------------------------------------------------------------------
# helpers
# ----------------------------------------------------------------------------
def _round_up(x, m):
    return ((x + m - 1) // m) * m


def _row_tile(m, target=512):
    """Largest row tile <= target that divides m and is a multiple of 8."""
    if m <= target:
        return m
    for tm in range(target, 7, -1):
        if m % tm == 0 and tm % 8 == 0:
            return tm
    return m


def _layer_norm(s, g, b):
    mu = jnp.mean(s, axis=-1, keepdims=True)
    var = jnp.mean(jnp.square(s - mu), axis=-1, keepdims=True)
    return (s - mu) * jax.lax.rsqrt(var + _LN_EPS) * g + b


# ----------------------------------------------------------------------------
# row-tiled linear kernels (resident bf16 weights)
# ----------------------------------------------------------------------------
def _proj_kernel(x_ref, w_ref, b_ref, *o_refs, n_out):
    """Fused multi-output linear: y = x @ w.T + b, split into n_out bf16 outputs."""
    x = x_ref[...].astype(jnp.bfloat16)
    y = jax.lax.dot_general(x, w_ref[...], _CONTRACT_NT,
                            preferred_element_type=jnp.float32)
    y = y + b_ref[...]
    n = y.shape[1] // n_out
    for i in range(n_out):
        o_refs[i][...] = y[:, i * n:(i + 1) * n].astype(jnp.bfloat16)


def pallas_proj(x, w, b, n_out):
    """x:(M,K) f32/bf16, w:(n_out*N,K) bf16 (pre-stacked), b:(1,n_out*N) f32."""
    m, k = x.shape
    n_total = w.shape[0]
    n = n_total // n_out
    tm = _row_tile(m)
    outs = pl.pallas_call(
        functools.partial(_proj_kernel, n_out=n_out),
        out_shape=tuple(jax.ShapeDtypeStruct((m, n), jnp.bfloat16)
                        for _ in range(n_out)),
        grid=(m // tm,),
        in_specs=[
            pl.BlockSpec((tm, k), lambda i: (i, 0)),
            pl.BlockSpec((n_total, k), lambda i: (0, 0)),
            pl.BlockSpec((1, n_total), lambda i: (0, 0)),
        ],
        out_specs=tuple(pl.BlockSpec((tm, n), lambda i: (i, 0))
                        for _ in range(n_out)),
        compiler_params=pltpu.CompilerParams(
            dimension_semantics=("parallel",), vmem_limit_bytes=_VMEM_LIMIT),
    )(x, w, b)
    return tuple(outs) if isinstance(outs, (list, tuple)) else (outs,)


def _linear_add_ln_kernel(x_ref, w_ref, b_ref, r_ref, g_ref, be_ref, o_ref):
    """out = LayerNorm(x @ w.T + b + residual)   (f32 residual / LN)."""
    y = jax.lax.dot_general(x_ref[...].astype(jnp.bfloat16), w_ref[...],
                            _CONTRACT_NT, preferred_element_type=jnp.float32)
    s = y + b_ref[...] + r_ref[...]
    o_ref[...] = _layer_norm(s, g_ref[...], be_ref[...])


def pallas_linear_add_ln(x, w, b, residual, gamma, beta):
    m, k = x.shape
    n = w.shape[0]
    tm = _row_tile(m)
    return pl.pallas_call(
        _linear_add_ln_kernel,
        out_shape=jax.ShapeDtypeStruct((m, n), jnp.float32),
        grid=(m // tm,),
        in_specs=[
            pl.BlockSpec((tm, k), lambda i: (i, 0)),
            pl.BlockSpec((n, k), lambda i: (0, 0)),
            pl.BlockSpec((1, n), lambda i: (0, 0)),
            pl.BlockSpec((tm, n), lambda i: (i, 0)),
            pl.BlockSpec((1, n), lambda i: (0, 0)),
            pl.BlockSpec((1, n), lambda i: (0, 0)),
        ],
        out_specs=pl.BlockSpec((tm, n), lambda i: (i, 0)),
        compiler_params=pltpu.CompilerParams(
            dimension_semantics=("parallel",), vmem_limit_bytes=_VMEM_LIMIT),
    )(x, w, b, residual, gamma, beta)


def _ffn_ln_kernel(x_ref, w1_ref, b1_ref, w2_ref, b2_ref, g_ref, be_ref, o_ref):
    """out = LayerNorm(FFN_suf(relu(FFN_pre(x))) + x); hidden stays in VMEM."""
    x = x_ref[...]
    h = jax.lax.dot_general(x.astype(jnp.bfloat16), w1_ref[...], _CONTRACT_NT,
                            preferred_element_type=jnp.float32) + b1_ref[...]
    h = jnp.maximum(h, 0.0).astype(jnp.bfloat16)
    y = jax.lax.dot_general(h, w2_ref[...], _CONTRACT_NT,
                            preferred_element_type=jnp.float32) + b2_ref[...]
    o_ref[...] = _layer_norm(y + x, g_ref[...], be_ref[...])


def pallas_ffn_ln(x, w1, b1, w2, b2, gamma, beta):
    m, d = x.shape
    dff = w1.shape[0]
    tm = _row_tile(m)
    return pl.pallas_call(
        _ffn_ln_kernel,
        out_shape=jax.ShapeDtypeStruct((m, d), jnp.float32),
        grid=(m // tm,),
        in_specs=[
            pl.BlockSpec((tm, d), lambda i: (i, 0)),
            pl.BlockSpec((dff, d), lambda i: (0, 0)),
            pl.BlockSpec((1, dff), lambda i: (0, 0)),
            pl.BlockSpec((d, dff), lambda i: (0, 0)),
            pl.BlockSpec((1, d), lambda i: (0, 0)),
            pl.BlockSpec((1, d), lambda i: (0, 0)),
            pl.BlockSpec((1, d), lambda i: (0, 0)),
        ],
        out_specs=pl.BlockSpec((tm, d), lambda i: (i, 0)),
        compiler_params=pltpu.CompilerParams(
            dimension_semantics=("parallel",), vmem_limit_bytes=_VMEM_LIMIT),
    )(x, w1, b1, w2, b2, gamma, beta)


# ----------------------------------------------------------------------------
# fused relative-global-attention kernel
#   grid = (B, H, Lq/tq); Srel (QE + qe-masking + skew) computed in VMEM.
# ----------------------------------------------------------------------------
def _attn_kernel(q_ref, k_ref, v_ref, e_ref, *rest, lq, lk, m_rel, tq, mask_mode):
    if mask_mode == "dense":
        bias_ref, o_ref = rest
    else:
        (o_ref,) = rest

    row0 = pl.program_id(2) * tq                       # first global query row
    q = q_ref[0, 0]                                    # (tq, dh) bf16 (scale folded in Wq)
    k = k_ref[0, 0]                                    # (lk, dh) bf16
    v = v_ref[0, 0]                                    # (lk, dh) bf16

    # --- relative term: QE + '_qe_masking' + skew, all in VMEM -------------
    p_rel = e_ref.shape[0]                             # lane-padded M (multiple of 128)
    qe = jax.lax.dot_general(q, e_ref[...], _CONTRACT_NT,
                             preferred_element_type=jnp.float32)     # (tq, P)
    # skew: srel[i, j] = qe[i, j + (M-1) - i_global]  (per-row lane shift)
    # implemented as two lane rotates (per-row strided + uniform), each < P.
    srel = pltpu.roll(qe, row0, 1, stride=1, stride_axis=0)   # shift_i = i_global
    static_shift = (p_rel - m_rel + 1) % p_rel
    if static_shift:
        srel = pltpu.roll(srel, static_shift, 1)
    rows = row0 + jax.lax.broadcasted_iota(jnp.int32, (tq, p_rel), 0)
    cols = jax.lax.broadcasted_iota(jnp.int32, (tq, p_rel), 1)
    srel = jnp.where(cols <= rows, srel, 0.0)          # '_qe_masking' after skew

    # --- logits = q k^T + Srel (+ mask bias) --------------------------------
    logits = jax.lax.dot_general(q, k, _CONTRACT_NT,
                                 preferred_element_type=jnp.float32)  # (tq, lk)
    if lk >= lq:
        off = lk - lq
        rel = srel[:, :lq]
        if off:
            rel = jnp.pad(rel, ((0, 0), (off, 0)))     # reference front-pad for len_k > len_q
        logits = logits + rel
    else:
        logits = logits + srel[:, :lk]

    if mask_mode == "causal":
        krows = row0 + jax.lax.broadcasted_iota(jnp.int32, (tq, lk), 0)
        kcols = jax.lax.broadcasted_iota(jnp.int32, (tq, lk), 1)
        logits = logits + jnp.where(kcols > krows, _NEG_BIG, 0.0)
    elif mask_mode == "dense":
        logits = logits + bias_ref[...]

    # --- softmax (EUP reciprocal) + PV matmul --------------------------------
    mx = jnp.max(logits, axis=-1, keepdims=True)
    probs = jnp.exp(logits - mx)
    inv = pl.reciprocal(jnp.sum(probs, axis=-1, keepdims=True), approx=True)
    out = jax.lax.dot_general((probs * inv).astype(jnp.bfloat16), v, _CONTRACT_NN,
                              preferred_element_type=jnp.float32)
    o_ref[0, 0] = out.astype(jnp.bfloat16)


def pallas_attention(q, k, v, e_pad, mask_mode, bias, *, m_rel):
    """q:(B,H,Lq,dh) k,v:(B,H,Lk,dh) bf16; e_pad:(P,dh) bf16 -> (B,H,Lq,dh) bf16."""
    b, h, lq, dh = q.shape
    lk = k.shape[2]
    tq = _row_tile(lq, target=256)
    grid = (b, h, lq // tq)
    in_specs = [
        pl.BlockSpec((1, 1, tq, dh), lambda bi, hi, qi: (bi, hi, qi, 0)),
        pl.BlockSpec((1, 1, lk, dh), lambda bi, hi, qi: (bi, hi, 0, 0)),
        pl.BlockSpec((1, 1, lk, dh), lambda bi, hi, qi: (bi, hi, 0, 0)),
        pl.BlockSpec(e_pad.shape, lambda bi, hi, qi: (0, 0)),
    ]
    args = [q, k, v, e_pad]
    if mask_mode == "dense":
        in_specs.append(pl.BlockSpec((tq, lk), lambda bi, hi, qi: (qi, 0)))
        args.append(bias)
    return pl.pallas_call(
        functools.partial(_attn_kernel, lq=lq, lk=lk, m_rel=m_rel, tq=tq,
                          mask_mode=mask_mode),
        out_shape=jax.ShapeDtypeStruct((b, h, lq, dh), jnp.bfloat16),
        grid=grid,
        in_specs=in_specs,
        out_specs=pl.BlockSpec((1, 1, tq, dh), lambda bi, hi, qi: (bi, hi, qi, 0)),
        compiler_params=pltpu.CompilerParams(
            dimension_semantics=("parallel", "parallel", "parallel"),
            vmem_limit_bytes=_VMEM_LIMIT),
    )(*args)


# ----------------------------------------------------------------------------
# RelativeGlobalAttention forward (Pallas kernels + layout glue)
# ----------------------------------------------------------------------------
def rga_attention(p, q_in, kv_in, mask_mode, bias, h, max_seq):
    """Relative global attention WITHOUT the final fc (fc+add+LN fused by caller)."""
    b, lq, d = q_in.shape
    dh = d // h
    assert lq <= max_seq, "reference module assumes len_q <= max_seq"

    if kv_in is None:                                   # self-attention: fused QKV
        lk = lq
        q, k, v = pallas_proj(q_in.reshape(b * lq, d), p["wqkv"], p["bqkv"], 3)
    else:                                               # cross-attention: Q + fused KV
        lk = kv_in.shape[1]
        (q,) = pallas_proj(q_in.reshape(b * lq, d), p["wq"], p["bq"], 1)
        k, v = pallas_proj(kv_in.reshape(b * lk, d), p["wkv"], p["bkv"], 2)

    # head split (B,L,d) -> (B,H,L,dh): pure layout glue on bf16 tensors
    q = q.reshape(b, lq, h, dh).transpose(0, 2, 1, 3)
    k = k.reshape(b, lk, h, dh).transpose(0, 2, 1, 3)
    v = v.reshape(b, lk, h, dh).transpose(0, 2, 1, 3)

    # relative embedding slice (M == Lq because lq <= max_seq), lane-padded
    m_rel = lq
    e = p["E"][max_seq - lq:, :]                        # (M, dh) bf16, static slice
    p_rel = max(128, _round_up(m_rel, 128))
    e_pad = jnp.pad(e, ((0, p_rel - m_rel), (0, 0)))

    attn = pallas_attention(q, k, v, e_pad, mask_mode, bias, m_rel=m_rel)
    return attn.transpose(0, 2, 1, 3).reshape(b, lq, d)  # head merge (glue)


# ----------------------------------------------------------------------------
# Decoder layer / full decoder
# ----------------------------------------------------------------------------
def decoder_layer_forward(p, x, enc_out, src_mode, src_bias, tgt_mode, tgt_bias,
                          h, max_seq):
    b, l, d = x.shape
    x_flat = x.reshape(b * l, d)

    # self-attention block: rga -> fc + residual + LN (fused)
    attn1 = rga_attention(p["rga"], x, None, tgt_mode, tgt_bias, h, max_seq)
    out1_flat = pallas_linear_add_ln(attn1.reshape(b * l, d),
                                     p["rga"]["fc_w"], p["rga"]["fc_b"],
                                     x_flat, p["ln1_g"], p["ln1_b"])
    out1 = out1_flat.reshape(b, l, d)

    # cross-attention block
    attn2 = rga_attention(p["rga2"], out1, enc_out, src_mode, src_bias, h, max_seq)
    out2_flat = pallas_linear_add_ln(attn2.reshape(b * l, d),
                                     p["rga2"]["fc_w"], p["rga2"]["fc_b"],
                                     out1_flat, p["ln2_g"], p["ln2_b"])

    # FFN block (FFN_pre + ReLU + FFN_suf + residual + LN fused)
    out_flat = pallas_ffn_ln(out2_flat,
                             p["ffn1_w"], p["ffn1_b"],
                             p["ffn2_w"], p["ffn2_b"],
                             p["ln3_g"], p["ln3_b"])
    return out_flat.reshape(b, l, d)


@functools.partial(jax.jit,
                   static_argnames=("h", "max_seq", "src_mode", "tgt_mode"))
def _decoder_core(params, tokens, encode_out, src_bias, tgt_bias, *,
                  h, max_seq, src_mode, tgt_mode):
    d = params["embedding"].shape[1]
    b, l = tokens.shape
    # embedding gather + scale + sinusoidal positional encoding (XLA glue)
    x = params["embedding"][tokens] * math.sqrt(d)
    x = x + params["pos"][None, :l, :]
    # dropout (rate=0.1) is identity in eval-mode forward
    for lp in params["layers"]:
        x = decoder_layer_forward(lp, x, encode_out, src_mode, src_bias,
                                  tgt_mode, tgt_bias, h, max_seq)
    return x


def _mask_mode(mask, lq, lk):
    """Return (static mode, optional dense bias) for the attention kernel."""
    if mask is None:
        return "none", None
    m_int = np.asarray(mask).astype(np.int64)
    assert m_int.ndim == 2 and m_int.shape == (lq, lk), "mask must be (len_q, len_k)"
    if lq == lk and np.array_equal(m_int, np.triu(np.ones((lq, lq), np.int64), k=1)):
        return "causal", None                           # generated in-kernel via iota
    return "dense", jnp.asarray(m_int, jnp.float32) * jnp.float32(_NEG_BIG)


def decoder_music_forward(params, config, tokens, encode_out,
                          src_mask=None, tgt_mask=None):
    b, l = tokens.shape
    lk = encode_out.shape[1]
    tgt_mode, tgt_bias = _mask_mode(tgt_mask, l, l)
    src_mode, src_bias = _mask_mode(src_mask, l, lk)
    return _decoder_core(params, jnp.asarray(tokens, jnp.int32), encode_out,
                         src_bias, tgt_bias,
                         h=config["h"], max_seq=config["max_len"],
                         src_mode=src_mode, tgt_mode=tgt_mode)


# ----------------------------------------------------------------------------
# Deterministic parameter initialization + one-time preparation
# (bf16 pre-cast, QKV/KV stacking, 1/sqrt(dh) folded into Wq/bq)
# ----------------------------------------------------------------------------
def _init_linear(key, in_f, out_f):
    k1, k2 = jax.random.split(key)
    bound = 1.0 / math.sqrt(in_f)
    return {"w": jax.random.uniform(k1, (out_f, in_f), jnp.float32, -bound, bound),
            "b": jax.random.uniform(k2, (out_f,), jnp.float32, -bound, bound)}


def _init_rga(key, d, h, max_seq):
    ks = jax.random.split(key, 5)
    return {"Wq": _init_linear(ks[0], d, d),
            "Wk": _init_linear(ks[1], d, d),
            "Wv": _init_linear(ks[2], d, d),
            "fc": _init_linear(ks[3], d, d),
            "E": jax.random.normal(ks[4], (max_seq, d // h), jnp.float32)}


def _init_layer(key, d, h, max_seq):
    ks = jax.random.split(key, 4)
    ln = lambda: {"g": jnp.ones((d,), jnp.float32), "b": jnp.zeros((d,), jnp.float32)}
    return {"rga": _init_rga(ks[0], d, h, max_seq),
            "rga2": _init_rga(ks[1], d, h, max_seq),
            "FFN_pre": _init_linear(ks[2], d, d // 2),
            "FFN_suf": _init_linear(ks[3], d // 2, d),
            "ln1": ln(), "ln2": ln(), "ln3": ln()}


def _prepare_rga(raw, h, self_attn):
    d = raw["Wq"]["w"].shape[0]
    scale = 1.0 / math.sqrt(d // h)                     # folded 1/sqrt(dh)
    wq = raw["Wq"]["w"] * scale
    bq = raw["Wq"]["b"] * scale
    out = {"fc_w": raw["fc"]["w"].astype(jnp.bfloat16),
           "fc_b": raw["fc"]["b"].reshape(1, d),
           "E": raw["E"].astype(jnp.bfloat16)}
    if self_attn:
        out["wqkv"] = jnp.concatenate([wq, raw["Wk"]["w"], raw["Wv"]["w"]],
                                      axis=0).astype(jnp.bfloat16)
        out["bqkv"] = jnp.concatenate([bq, raw["Wk"]["b"], raw["Wv"]["b"]],
                                      axis=0).reshape(1, 3 * d)
    else:
        out["wq"] = wq.astype(jnp.bfloat16)
        out["bq"] = bq.reshape(1, d)
        out["wkv"] = jnp.concatenate([raw["Wk"]["w"], raw["Wv"]["w"]],
                                     axis=0).astype(jnp.bfloat16)
        out["bkv"] = jnp.concatenate([raw["Wk"]["b"], raw["Wv"]["b"]],
                                     axis=0).reshape(1, 2 * d)
    return out


def _prepare_layer(raw, h):
    d = raw["FFN_suf"]["w"].shape[0]
    dff = raw["FFN_pre"]["w"].shape[0]
    return {"rga": _prepare_rga(raw["rga"], h, self_attn=True),
            "rga2": _prepare_rga(raw["rga2"], h, self_attn=False),
            "ffn1_w": raw["FFN_pre"]["w"].astype(jnp.bfloat16),
            "ffn1_b": raw["FFN_pre"]["b"].reshape(1, dff),
            "ffn2_w": raw["FFN_suf"]["w"].astype(jnp.bfloat16),
            "ffn2_b": raw["FFN_suf"]["b"].reshape(1, d),
            "ln1_g": raw["ln1"]["g"].reshape(1, d), "ln1_b": raw["ln1"]["b"].reshape(1, d),
            "ln2_g": raw["ln2"]["g"].reshape(1, d), "ln2_b": raw["ln2"]["b"].reshape(1, d),
            "ln3_g": raw["ln3"]["g"].reshape(1, d), "ln3_b": raw["ln3"]["b"].reshape(1, d)}


def _make_pos_encoding(d, max_seq):
    pos = np.arange(max_seq, dtype=np.float64)[:, None]
    i = np.arange(d, dtype=np.float64)[None, :]
    arg = (pos * np.exp(-np.log(10000.0) * i / d) * np.exp(np.log(10000.0) / d * (i % 2))
           + 0.5 * np.pi * (i % 2))
    return jnp.asarray(np.sin(arg), dtype=jnp.float32)          # (max_seq, d)


def init_decoder_music(key, num_layers, d_model, input_vocab_size, max_len,
                       pad_token=0):
    h = d_model // 64
    ks = jax.random.split(key, num_layers + 1)
    emb = jax.random.normal(ks[0], (input_vocab_size, d_model), jnp.float32)
    emb = emb.at[pad_token].set(0.0)                            # padding_idx row
    raw_layers = [_init_layer(ks[i + 1], d_model, h, max_len)
                  for i in range(num_layers)]
    params = {"embedding": emb,
              "pos": _make_pos_encoding(d_model, max_len),
              "layers": [_prepare_layer(lp, h) for lp in raw_layers]}
    config = {"d_model": d_model, "max_len": max_len, "h": h}
    return params, config


# ----------------------------------------------------------------------------
if __name__ == "__main__":
    num_layers = 2
    d_model = 128          # h = d_model // 64 = 2 heads, dh = 64
    vocab = 50
    max_len = 32
    B, L = 2, 16

    root = jax.random.PRNGKey(0)
    k_params, k_tok, k_enc = jax.random.split(root, 3)

    params, config = init_decoder_music(k_params, num_layers, d_model, vocab, max_len)

    tokens = jax.random.randint(k_tok, (B, L), 0, vocab, dtype=jnp.int32)
    encode_out = jax.random.normal(k_enc, (B, L, d_model), jnp.float32)
    # causal look-ahead mask: 1 = masked (future position)
    tgt_mask = jnp.triu(jnp.ones((L, L), jnp.float32), k=1)

    out = decoder_music_forward(params, config, tokens, encode_out,
                                src_mask=None, tgt_mask=tgt_mask)
    out = jax.block_until_ready(out)

    assert out.shape == (B, L, d_model)
    assert bool(jnp.all(jnp.isfinite(out)))
    print("KERNEL_OK")
</pallas_src>

<mosaic_0001>
module attributes {stable_mosaic.version = 11 : i64} {
  func.func @_proj_kernel(%arg0: i32, %arg1: memref<32x128xf32, #tpu.memory_space<vmem>>, %arg2: memref<384x128xbf16, #tpu.memory_space<vmem>>, %arg3: memref<1x384xf32, #tpu.memory_space<vmem>>, %arg4: memref<32x128xbf16, #tpu.memory_space<vmem>>, %arg5: memref<32x128xbf16, #tpu.memory_space<vmem>>, %arg6: memref<32x128xbf16, #tpu.memory_space<vmem>>) attributes {dimension_semantics = [#tpu.dimension_semantics<parallel>], iteration_bounds = array<i64: 1>, scalar_prefetch = 0 : i64, scratch_operands = 0 : i64, tpu.core_type = #tpu.core_type<tc>, window_params = [{transform_indices = @transform_0, window_bounds = array<i64: 32, 128>}, {pipeline_mode = #tpu.pipeline_mode<synchronous>, transform_indices = @transform_1, window_bounds = array<i64: 384, 128>}, {pipeline_mode = #tpu.pipeline_mode<synchronous>, transform_indices = @transform_2, window_bounds = array<i64: 1, 384>}, {transform_indices = @transform_3, window_bounds = array<i64: 32, 128>}, {transform_indices = @transform_4, window_bounds = array<i64: 32, 128>}, {transform_indices = @transform_5, window_bounds = array<i64: 32, 128>}]} {
    %c0 = arith.constant 0 : index
    %c0_0 = arith.constant 0 : index
    %0 = vector.load %arg1[%c0, %c0_0] : memref<32x128xf32, #tpu.memory_space<vmem>>, vector<32x128xf32>
    %1 = arith.truncf %0 : vector<32x128xf32> to vector<32x128xbf16>
    %c0_1 = arith.constant 0 : index
    %c0_2 = arith.constant 0 : index
    %2 = vector.load %arg2[%c0_1, %c0_2] : memref<384x128xbf16, #tpu.memory_space<vmem>>, vector<384x128xbf16>
    %cst = arith.constant dense<0.000000e+00> : vector<32x384xf32>
    %3 = tpu.matmul %1, %2, %cst {dimension_numbers = #tpu.dot_dimension_numbers<[1], [1], [0], [0], [0, 0, 1, 0], [], []>} : vector<32x128xbf16>, vector<384x128xbf16>, vector<32x384xf32> -> vector<32x384xf32>
    %c0_3 = arith.constant 0 : index
    %c0_4 = arith.constant 0 : index
    %4 = vector.load %arg3[%c0_3, %c0_4] : memref<1x384xf32, #tpu.memory_space<vmem>>, vector<1x384xf32>
    %5 = vector.broadcast %4 : vector<1x384xf32> to vector<32x384xf32>
    %6 = arith.addf %3, %5 : vector<32x384xf32>
    %7 = vector.extract_strided_slice %6 {offsets = [0, 0], sizes = [32, 128], strides = [1, 1]} : vector<32x384xf32> to vector<32x128xf32>
    %8 = arith.truncf %7 : vector<32x128xf32> to vector<32x128xbf16>
    %c0_5 = arith.constant 0 : index
    %c0_6 = arith.constant 0 : index
    %9 = vector.load %arg4[%c0_5, %c0_6] : memref<32x128xbf16, #tpu.memory_space<vmem>>, vector<32x128xbf16>
    tpu.vector_store %arg4[%c0_5, %c0_6], %8 {strides = array<i32>} : memref<32x128xbf16, #tpu.memory_space<vmem>>, vector<32x128xbf16>,
    %10 = vector.extract_strided_slice %6 {offsets = [0, 128], sizes = [32, 128], strides = [1, 1]} : vector<32x384xf32> to vector<32x128xf32>
    %11 = arith.truncf %10 : vector<32x128xf32> to vector<32x128xbf16>
    %c0_7 = arith.constant 0 : index
    %c0_8 = arith.constant 0 : index
    %12 = vector.load %arg5[%c0_7, %c0_8] : memref<32x128xbf16, #tpu.memory_space<vmem>>, vector<32x128xbf16>
    tpu.vector_store %arg5[%c0_7, %c0_8], %11 {strides = array<i32>} : memref<32x128xbf16, #tpu.memory_space<vmem>>, vector<32x128xbf16>,
    %13 = vector.extract_strided_slice %6 {offsets = [0, 256], sizes = [32, 128], strides = [1, 1]} : vector<32x384xf32> to vector<32x128xf32>
    %14 = arith.truncf %13 : vector<32x128xf32> to vector<32x128xbf16>
    %c0_9 = arith.constant 0 : index
    %c0_10 = arith.constant 0 : index
    %15 = vector.load %arg6[%c0_9, %c0_10] : memref<32x128xbf16, #tpu.memory_space<vmem>>, vector<32x128xbf16>
    tpu.vector_store %arg6[%c0_9, %c0_10], %14 {strides = array<i32>} : memref<32x128xbf16, #tpu.memory_space<vmem>>, vector<32x128xbf16>,
    return
  }
  func.func @transform_0(%arg0: i32) -> (i32, i32) {
    %c0_i32 = arith.constant 0 : i32
    %c0_i32_0 = arith.constant 0 : i32
    return %arg0, %c0_i32 : i32, i32
  }
  func.func @transform_1(%arg0: i32) -> (i32, i32) {
    %c0_i32 = arith.constant 0 : i32
    %c0_i32_0 = arith.constant 0 : i32
    %c0_i32_1 = arith.constant 0 : i32
    return %c0_i32, %c0_i32_0 : i32, i32
  }
  func.func @transform_2(%arg0: i32) -> (i32, i32) {
    %c0_i32 = arith.constant 0 : i32
    %c0_i32_0 = arith.constant 0 : i32
    %c0_i32_1 = arith.constant 0 : i32
    return %c0_i32, %c0_i32_0 : i32, i32
  }
  func.func @transform_3(%arg0: i32) -> (i32, i32) {
    %c0_i32 = arith.constant 0 : i32
    %c0_i32_0 = arith.constant 0 : i32
    return %arg0, %c0_i32 : i32, i32
  }
  func.func @transform_4(%arg0: i32) -> (i32, i32) {
    %c0_i32 = arith.constant 0 : i32
    %c0_i32_0 = arith.constant 0 : i32
    return %arg0, %c0_i32 : i32, i32
  }
  func.func @transform_5(%arg0: i32) -> (i32, i32) {
    %c0_i32 = arith.constant 0 : i32
    %c0_i32_0 = arith.constant 0 : i32
    return %arg0, %c0_i32 : i32, i32
  }
}

module attributes {stable_mosaic.version = 11 : i64} {
  func.func @_attn_kernel(%arg0: i32, %arg1: i32, %arg2: i32, %arg3: memref<1x1x16x64xbf16, #tpu.memory_space<vmem>>, %arg4: memref<1x1x16x64xbf16, #tpu.memory_space<vmem>>, %arg5: memref<1x1x16x64xbf16, #tpu.memory_space<vmem>>, %arg6: memref<128x64xbf16, #tpu.memory_space<vmem>>, %arg7: memref<1x1x16x64xbf16, #tpu.memory_space<vmem>>) attributes {dimension_semantics = [#tpu.dimension_semantics<parallel>, #tpu.dimension_semantics<parallel>, #tpu.dimension_semantics<parallel>], iteration_bounds = array<i64: 2, 2, 1>, scalar_prefetch = 0 : i64, scratch_operands = 0 : i64, tpu.core_type = #tpu.core_type<tc>, window_params = [{transform_indices = @transform_0, window_bounds = array<i64: 1, 1, 16, 64>}, {transform_indices = @transform_1, window_bounds = array<i64: 1, 1, 16, 64>}, {transform_indices = @transform_2, window_bounds = array<i64: 1, 1, 16, 64>}, {pipeline_mode = #tpu.pipeline_mode<synchronous>, transform_indices = @transform_3, window_bounds = array<i64: 128, 64>}, {transform_indices = @transform_4, window_bounds = array<i64: 1, 1, 16, 64>}]} {
    %c16_i32 = arith.constant 16 : i32
    %0 = arith.muli %arg2, %c16_i32 : i32
    %c0 = arith.constant 0 : index
    %c0_0 = arith.constant 0 : index
    %c0_1 = arith.constant 0 : index
    %c0_2 = arith.constant 0 : index
    %1 = vector.load %arg3[%c0, %c0_0, %c0_1, %c0_2] : memref<1x1x16x64xbf16, #tpu.memory_space<vmem>>, vector<1x1x16x64xbf16>
    %2 = vector.shape_cast %1 : vector<1x1x16x64xbf16> to vector<16x64xbf16>
    %c0_3 = arith.constant 0 : index
    %c0_4 = arith.constant 0 : index
    %c0_5 = arith.constant 0 : index
    %c0_6 = arith.constant 0 : index
    %3 = vector.load %arg4[%c0_3, %c0_4, %c0_5, %c0_6] : memref<1x1x16x64xbf16, #tpu.memory_space<vmem>>, vector<1x1x16x64xbf16>
    %4 = vector.shape_cast %3 : vector<1x1x16x64xbf16> to vector<16x64xbf16>
    %c0_7 = arith.constant 0 : index
    %c0_8 = arith.constant 0 : index
    %c0_9 = arith.constant 0 : index
    %c0_10 = arith.constant 0 : index
    %5 = vector.load %arg5[%c0_7, %c0_8, %c0_9, %c0_10] : memref<1x1x16x64xbf16, #tpu.memory_space<vmem>>, vector<1x1x16x64xbf16>
    %6 = vector.shape_cast %5 : vector<1x1x16x64xbf16> to vector<16x64xbf16>
    %c0_11 = arith.constant 0 : index
    %c0_12 = arith.constant 0 : index
    %7 = vector.load %arg6[%c0_11, %c0_12] : memref<128x64xbf16, #tpu.memory_space<vmem>>, vector<128x64xbf16>
    %cst = arith.constant dense<0.000000e+00> : vector<16x128xf32>
    %8 = tpu.matmul %2, %7, %cst {dimension_numbers = #tpu.dot_dimension_numbers<[1], [1], [0], [0], [0, 0, 1, 0], [], []>} : vector<16x64xbf16>, vector<128x64xbf16>, vector<16x128xf32> -> vector<16x128xf32>
    %9 = tpu.dynamic_rotate %8 by %0 dim 1 {stride = 1 : si32, stride_dimension = 0 : si32} : vector<16x128xf32>, i32 -> vector<16x128xf32>
    %c113_i32 = arith.constant 113 : i32
    %10 = tpu.dynamic_rotate %9 by %c113_i32 dim 1 : vector<16x128xf32>, i32 -> vector<16x128xf32>
    %11 = tpu.iota {dimensions = array<i32: 0>} : vector<16x128xi32>
    %12 = vector.broadcast %0 : i32 to vector<16x128xi32>
    %13 = arith.addi %12, %11 : vector<16x128xi32>
    %14 = tpu.iota {dimensions = array<i32: 1>} : vector<16x128xi32>
    %15 = arith.cmpi sle, %14, %13 : vector<16x128xi32>
    %cst_13 = arith.constant 0.000000e+00 : f32
    %16 = vector.broadcast %cst_13 : f32 to vector<16x128xf32>
    %17 = arith.select %15, %10, %16 : vector<16x128xi1>, vector<16x128xf32>
    %cst_14 = arith.constant dense<0.000000e+00> : vector<16x16xf32>
    %18 = tpu.matmul %2, %4, %cst_14 {dimension_numbers = #tpu.dot_dimension_numbers<[1], [1], [0], [0], [0, 0, 1, 0], [], []>} : vector<16x64xbf16>, vector<16x64xbf16>, vector<16x16xf32> -> vector<16x16xf32>
    %19 = vector.extract_strided_slice %17 {offsets = [0, 0], sizes = [16, 16], strides = [1, 1]} : vector<16x128xf32> to vector<16x16xf32>
    %20 = arith.addf %18, %19 : vector<16x16xf32>
    %21 = tpu.iota {dimensions = array<i32: 0>} : vector<16x16xi32>
    %22 = vector.broadcast %0 : i32 to vector<16x16xi32>
    %23 = arith.addi %22, %21 : vector<16x16xi32>
    %24 = tpu.iota {dimensions = array<i32: 1>} : vector<16x16xi32>
    %25 = arith.cmpi sgt, %24, %23 : vector<16x16xi32>
    %cst_15 = arith.constant -1.000000e+09 : f32
    %cst_16 = arith.constant 0.000000e+00 : f32
    %26 = vector.broadcast %cst_15 : f32 to vector<16x16xf32>
    %27 = vector.broadcast %cst_16 : f32 to vector<16x16xf32>
    %28 = arith.select %25, %26, %27 : vector<16x16xi1>, vector<16x16xf32>
    %29 = arith.addf %20, %28 : vector<16x16xf32>
    %cst_17 = arith.constant dense<0xFF800000> : vector<16xf32>
    %30 = vector.multi_reduction <maximumf>, %29, %cst_17 [1] : vector<16x16xf32> to vector<16xf32>
    %31 = vector.shape_cast %30 : vector<16xf32> to vector<16x1xf32>
    %32 = vector.broadcast %31 : vector<16x1xf32> to vector<16x16xf32>
    %33 = arith.subf %29, %32 : vector<16x16xf32>
    %34 = math.exp %33 : vector<16x16xf32>
    %cst_18 = arith.constant dense<0.000000e+00> : vector<16xf32>
    %35 = vector.multi_reduction <add>, %34, %cst_18 [1] : vector<16x16xf32> to vector<16xf32>
    %36 = vector.shape_cast %35 : vector<16xf32> to vector<16x1xf32>
    %37 = tpu.reciprocal %36 {approx = true} : vector<16x1xf32> -> vector<16x1xf32>
    %38 = vector.broadcast %37 : vector<16x1xf32> to vector<16x16xf32>
    %39 = arith.mulf %34, %38 : vector<16x16xf32>
    %40 = arith.truncf %39 : vector<16x16xf32> to vector<16x16xbf16>
    %cst_19 = arith.constant dense<0.000000e+00> : vector<16x64xf32>
    %41 = tpu.matmul %40, %6, %cst_19 {dimension_numbers = #tpu.dot_dimension_numbers<[1], [0], [0], [1], [0, 0, 1, 1], [], []>} : vector<16x16xbf16>, vector<16x64xbf16>, vector<16x64xf32> -> vector<16x64xf32>
    %42 = arith.truncf %41 : vector<16x64xf32> to vector<16x64xbf16>
    %c0_20 = arith.constant 0 : index
    %c0_21 = arith.constant 0 : index
    %c0_22 = arith.constant 0 : index
    %c0_23 = arith.constant 0 : index
    %43 = vector.load %arg7[%c0_20, %c0_21, %c0_22, %c0_23] : memref<1x1x16x64xbf16, #tpu.memory_space<vmem>>, vector<1x1x16x64xbf16>
    %44 = vector.shape_cast %43 : vector<1x1x16x64xbf16> to vector<16x64xbf16>
    %45 = vector.shape_cast %42 : vector<16x64xbf16> to vector<1x1x16x64xbf16>
    tpu.vector_store %arg7[%c0_20, %c0_21, %c0_22, %c0_23], %45 {strides = array<i32>} : memref<1x1x16x64xbf16, #tpu.memory_space<vmem>>, vector<1x1x16x64xbf16>,
    return
  }
  func.func @transform_0(%arg0: i32, %arg1: i32, %arg2: i32) -> (i32, i32, i32, i32) {
    %c0_i32 = arith.constant 0 : i32
    %c0_i32_0 = arith.constant 0 : i32
    return %arg0, %arg1, %arg2, %c0_i32 : i32, i32, i32, i32
  }
  func.func @transform_1(%arg0: i32, %arg1: i32, %arg2: i32) -> (i32, i32, i32, i32) {
    %c0_i32 = arith.constant 0 : i32
    %c0_i32_0 = arith.constant 0 : i32
    %c0_i32_1 = arith.constant 0 : i32
    return %arg0, %arg1, %c0_i32, %c0_i32_0 : i32, i32, i32, i32
  }
  func.func @transform_2(%arg0: i32, %arg1: i32, %arg2: i32) -> (i32, i32, i32, i32) {
    %c0_i32 = arith.constant 0 : i32
    %c0_i32_0 = arith.constant 0 : i32
    %c0_i32_1 = arith.constant 0 : i32
    return %arg0, %arg1, %c0_i32, %c0_i32_0 : i32, i32, i32, i32
  }
  func.func @transform_3(%arg0: i32, %arg1: i32, %arg2: i32) -> (i32, i32) {
    %c0_i32 = arith.constant 0 : i32
    %c0_i32_0 = arith.constant 0 : i32
    %c0_i32_1 = arith.constant 0 : i32
    return %c0_i32, %c0_i32_0 : i32, i32
  }
  func.func @transform_4(%arg0: i32, %arg1: i32, %arg2: i32) -> (i32, i32, i32, i32) {
    %c0_i32 = arith.constant 0 : i32
    %c0_i32_0 = arith.constant 0 : i32
    return %arg0, %arg1, %arg2, %c0_i32 : i32, i32, i32, i32
  }
}

module attributes {stable_mosaic.version = 11 : i64} {
  func.func @_linear_add_ln_kernel(%arg0: i32, %arg1: memref<32x128xbf16, #tpu.memory_space<vmem>>, %arg2: memref<128x128xbf16, #tpu.memory_space<vmem>>, %arg3: memref<1x128xf32, #tpu.memory_space<vmem>>, %arg4: memref<32x128xf32, #tpu.memory_space<vmem>>, %arg5: memref<1x128xf32, #tpu.memory_space<vmem>>, %arg6: memref<1x128xf32, #tpu.memory_space<vmem>>, %arg7: memref<32x128xf32, #tpu.memory_space<vmem>>) attributes {dimension_semantics = [#tpu.dimension_semantics<parallel>], iteration_bounds = array<i64: 1>, scalar_prefetch = 0 : i64, scratch_operands = 0 : i64, tpu.core_type = #tpu.core_type<tc>, window_params = [{transform_indices = @transform_0, window_bounds = array<i64: 32, 128>}, {pipeline_mode = #tpu.pipeline_mode<synchronous>, transform_indices = @transform_1, window_bounds = array<i64: 128, 128>}, {pipeline_mode = #tpu.pipeline_mode<synchronous>, transform_indices = @transform_2, window_bounds = array<i64: 1, 128>}, {transform_indices = @transform_3, window_bounds = array<i64: 32, 128>}, {pipeline_mode = #tpu.pipeline_mode<synchronous>, transform_indices = @transform_4, window_bounds = array<i64: 1, 128>}, {pipeline_mode = #tpu.pipeline_mode<synchronous>, transform_indices = @transform_5, window_bounds = array<i64: 1, 128>}, {transform_indices = @transform_6, window_bounds = array<i64: 32, 128>}]} {
    %c0 = arith.constant 0 : index
    %c0_0 = arith.constant 0 : index
    %0 = vector.load %arg1[%c0, %c0_0] : memref<32x128xbf16, #tpu.memory_space<vmem>>, vector<32x128xbf16>
    %c0_1 = arith.constant 0 : index
    %c0_2 = arith.constant 0 : index
    %1 = vector.load %arg2[%c0_1, %c0_2] : memref<128x128xbf16, #tpu.memory_space<vmem>>, vector<128x128xbf16>
    %cst = arith.constant dense<0.000000e+00> : vector<32x128xf32>
    %2 = tpu.matmul %0, %1, %cst {dimension_numbers = #tpu.dot_dimension_numbers<[1], [1], [0], [0], [0, 0, 1, 0], [], []>} : vector<32x128xbf16>, vector<128x128xbf16>, vector<32x128xf32> -> vector<32x128xf32>
    %c0_3 = arith.constant 0 : index
    %c0_4 = arith.constant 0 : index
    %3 = vector.load %arg3[%c0_3, %c0_4] : memref<1x128xf32, #tpu.memory_space<vmem>>, vector<1x128xf32>
    %4 = vector.broadcast %3 : vector<1x128xf32> to vector<32x128xf32>
    %5 = arith.addf %2, %4 : vector<32x128xf32>
    %c0_5 = arith.constant 0 : index
    %c0_6 = arith.constant 0 : index
    %6 = vector.load %arg4[%c0_5, %c0_6] : memref<32x128xf32, #tpu.memory_space<vmem>>, vector<32x128xf32>
    %7 = arith.addf %5, %6 : vector<32x128xf32>
    %c0_7 = arith.constant 0 : index
    %c0_8 = arith.constant 0 : index
    %8 = vector.load %arg5[%c0_7, %c0_8] : memref<1x128xf32, #tpu.memory_space<vmem>>, vector<1x128xf32>
    %c0_9 = arith.constant 0 : index
    %c0_10 = arith.constant 0 : index
    %9 = vector.load %arg6[%c0_9, %c0_10] : memref<1x128xf32, #tpu.memory_space<vmem>>, vector<1x128xf32>
    %cst_11 = arith.constant dense<0.000000e+00> : vector<32xf32>
    %10 = vector.multi_reduction <add>, %7, %cst_11 [1] : vector<32x128xf32> to vector<32xf32>
    %11 = vector.shape_cast %10 : vector<32xf32> to vector<32x1xf32>
    %cst_12 = arith.constant 1.280000e+02 : f32
    %12 = vector.broadcast %cst_12 : f32 to vector<32x1xf32>
    %13 = arith.divf %11, %12 : vector<32x1xf32>
    %14 = vector.broadcast %13 : vector<32x1xf32> to vector<32x128xf32>
    %15 = arith.subf %7, %14 : vector<32x128xf32>
    %16 = arith.mulf %15, %15 : vector<32x128xf32>
    %cst_13 = arith.constant dense<0.000000e+00> : vector<32xf32>
    %17 = vector.multi_reduction <add>, %16, %cst_13 [1] : vector<32x128xf32> to vector<32xf32>
    %18 = vector.shape_cast %17 : vector<32xf32> to vector<32x1xf32>
    %cst_14 = arith.constant 1.280000e+02 : f32
    %19 = vector.broadcast %cst_14 : f32 to vector<32x1xf32>
    %20 = arith.divf %18, %19 : vector<32x1xf32>
    %21 = vector.broadcast %13 : vector<32x1xf32> to vector<32x128xf32>
    %22 = arith.subf %7, %21 : vector<32x128xf32>
    %cst_15 = arith.constant 9.99999997E-7 : f32
    %23 = vector.broadcast %cst_15 : f32 to vector<32x1xf32>
    %24 = arith.addf %20, %23 : vector<32x1xf32>
    %25 = math.rsqrt %24 : vector<32x1xf32>
    %26 = vector.broadcast %25 : vector<32x1xf32> to vector<32x128xf32>
    %27 = arith.mulf %22, %26 : vector<32x128xf32>
    %28 = vector.broadcast %8 : vector<1x128xf32> to vector<32x128xf32>
    %29 = arith.mulf %27, %28 : vector<32x128xf32>
    %30 = vector.broadcast %9 : vector<1x128xf32> to vector<32x128xf32>
    %31 = arith.addf %29, %30 : vector<32x128xf32>
    %c0_16 = arith.constant 0 : index
    %c0_17 = arith.constant 0 : index
    %32 = vector.load %arg7[%c0_16, %c0_17] : memref<32x128xf32, #tpu.memory_space<vmem>>, vector<32x128xf32>
    tpu.vector_store %arg7[%c0_16, %c0_17], %31 {strides = array<i32>} : memref<32x128xf32, #tpu.memory_space<vmem>>, vector<32x128xf32>,
    return
  }
  func.func @transform_0(%arg0: i32) -> (i32, i32) {
    %c0_i32 = arith.constant 0 : i32
    %c0_i32_0 = arith.constant 0 : i32
    return %arg0, %c0_i32 : i32, i32
  }
  func.func @transform_1(%arg0: i32) -> (i32, i32) {
    %c0_i32 = arith.constant 0 : i32
    %c0_i32_0 = arith.constant 0 : i32
    %c0_i32_1 = arith.constant 0 : i32
    return %c0_i32, %c0_i32_0 : i32, i32
  }
  func.func @transform_2(%arg0: i32) -> (i32, i32) {
    %c0_i32 = arith.constant 0 : i32
    %c0_i32_0 = arith.constant 0 : i32
    %c0_i32_1 = arith.constant 0 : i32
    return %c0_i32, %c0_i32_0 : i32, i32
  }
  func.func @transform_3(%arg0: i32) -> (i32, i32) {
    %c0_i32 = arith.constant 0 : i32
    %c0_i32_0 = arith.constant 0 : i32
    return %arg0, %c0_i32 : i32, i32
  }
  func.func @transform_4(%arg0: i32) -> (i32, i32) {
    %c0_i32 = arith.constant 0 : i32
    %c0_i32_0 = arith.constant 0 : i32
    %c0_i32_1 = arith.constant 0 : i32
    return %c0_i32, %c0_i32_0 : i32, i32
  }
  func.func @transform_5(%arg0: i32) -> (i32, i32) {
    %c0_i32 = arith.constant 0 : i32
    %c0_i32_0 = arith.constant 0 : i32
    %c0_i32_1 = arith.constant 0 : i32
    return %c0_i32, %c0_i32_0 : i32, i32
  }
  func.func @transform_6(%arg0: i32) -> (i32, i32) {
    %c0_i32 = arith.constant 0 : i32
    %c0_i32_0 = arith.constant 0 : i32
    return %arg0, %c0_i32 : i32, i32
  }
}

module attributes {stable_mosaic.version = 11 : i64} {
  func.func @_proj_kernel(%arg0: i32, %arg1: memref<32x128xf32, #tpu.memory_space<vmem>>, %arg2: memref<128x128xbf16, #tpu.memory_space<vmem>>, %arg3: memref<1x128xf32, #tpu.memory_space<vmem>>, %arg4: memref<32x128xbf16, #tpu.memory_space<vmem>>) attributes {dimension_semantics = [#tpu.dimension_semantics<parallel>], iteration_bounds = array<i64: 1>, scalar_prefetch = 0 : i64, scratch_operands = 0 : i64, tpu.core_type = #tpu.core_type<tc>, window_params = [{transform_indices = @transform_0, window_bounds = array<i64: 32, 128>}, {pipeline_mode = #tpu.pipeline_mode<synchronous>, transform_indices = @transform_1, window_bounds = array<i64: 128, 128>}, {pipeline_mode = #tpu.pipeline_mode<synchronous>, transform_indices = @transform_2, window_bounds = array<i64: 1, 128>}, {transform_indices = @transform_3, window_bounds = array<i64: 32, 128>}]} {
    %c0 = arith.constant 0 : index
    %c0_0 = arith.constant 0 : index
    %0 = vector.load %arg1[%c0, %c0_0] : memref<32x128xf32, #tpu.memory_space<vmem>>, vector<32x128xf32>
    %1 = arith.truncf %0 : vector<32x128xf32> to vector<32x128xbf16>
    %c0_1 = arith.constant 0 : index
    %c0_2 = arith.constant 0 : index
    %2 = vector.load %arg2[%c0_1, %c0_2] : memref<128x128xbf16, #tpu.memory_space<vmem>>, vector<128x128xbf16>
    %cst = arith.constant dense<0.000000e+00> : vector<32x128xf32>
    %3 = tpu.matmul %1, %2, %cst {dimension_numbers = #tpu.dot_dimension_numbers<[1], [1], [0], [0], [0, 0, 1, 0], [], []>} : vector<32x128xbf16>, vector<128x128xbf16>, vector<32x128xf32> -> vector<32x128xf32>
    %c0_3 = arith.constant 0 : index
    %c0_4 = arith.constant 0 : index
    %4 = vector.load %arg3[%c0_3, %c0_4] : memref<1x128xf32, #tpu.memory_space<vmem>>, vector<1x128xf32>
    %5 = vector.broadcast %4 : vector<1x128xf32> to vector<32x128xf32>
    %6 = arith.addf %3, %5 : vector<32x128xf32>
    %7 = arith.truncf %6 : vector<32x128xf32> to vector<32x128xbf16>
    %c0_5 = arith.constant 0 : index
    %c0_6 = arith.constant 0 : index
    %8 = vector.load %arg4[%c0_5, %c0_6] : memref<32x128xbf16, #tpu.memory_space<vmem>>, vector<32x128xbf16>
    tpu.vector_store %arg4[%c0_5, %c0_6], %7 {strides = array<i32>} : memref<32x128xbf16, #tpu.memory_space<vmem>>, vector<32x128xbf16>,
    return
  }
  func.func @transform_0(%arg0: i32) -> (i32, i32) {
    %c0_i32 = arith.constant 0 : i32
    %c0_i32_0 = arith.constant 0 : i32
    return %arg0, %c0_i32 : i32, i32
  }
  func.func @transform_1(%arg0: i32) -> (i32, i32) {
    %c0_i32 = arith.constant 0 : i32
    %c0_i32_0 = arith.constant 0 : i32
    %c0_i32_1 = arith.constant 0 : i32
    return %c0_i32, %c0_i32_0 : i32, i32
  }
  func.func @transform_2(%arg0: i32) -> (i32, i32) {
    %c0_i32 = arith.constant 0 : i32
    %c0_i32_0 = arith.constant 0 : i32
    %c0_i32_1 = arith.constant 0 : i32
    return %c0_i32, %c0_i32_0 : i32, i32
  }
  func.func @transform_3(%arg0: i32) -> (i32, i32) {
    %c0_i32 = arith.constant 0 : i32
    %c0_i32_0 = arith.constant 0 : i32
    return %arg0, %c0_i32 : i32, i32
  }
}

module attributes {stable_mosaic.version = 11 : i64} {
  func.func @_proj_kernel(%arg0: i32, %arg1: memref<32x128xf32, #tpu.memory_space<vmem>>, %arg2: memref<256x128xbf16, #tpu.memory_space<vmem>>, %arg3: memref<1x256xf32, #tpu.memory_space<vmem>>, %arg4: memref<32x128xbf16, #tpu.memory_space<vmem>>, %arg5: memref<32x128xbf16, #tpu.memory_space<vmem>>) attributes {dimension_semantics = [#tpu.dimension_semantics<parallel>], iteration_bounds = array<i64: 1>, scalar_prefetch = 0 : i64, scratch_operands = 0 : i64, tpu.core_type = #tpu.core_type<tc>, window_params = [{transform_indices = @transform_0, window_bounds = array<i64: 32, 128>}, {pipeline_mode = #tpu.pipeline_mode<synchronous>, transform_indices = @transform_1, window_bounds = array<i64: 256, 128>}, {pipeline_mode = #tpu.pipeline_mode<synchronous>, transform_indices = @transform_2, window_bounds = array<i64: 1, 256>}, {transform_indices = @transform_3, window_bounds = array<i64: 32, 128>}, {transform_indices = @transform_4, window_bounds = array<i64: 32, 128>}]} {
    %c0 = arith.constant 0 : index
    %c0_0 = arith.constant 0 : index
    %0 = vector.load %arg1[%c0, %c0_0] : memref<32x128xf32, #tpu.memory_space<vmem>>, vector<32x128xf32>
    %1 = arith.truncf %0 : vector<32x128xf32> to vector<32x128xbf16>
    %c0_1 = arith.constant 0 : index
    %c0_2 = arith.constant 0 : index
    %2 = vector.load %arg2[%c0_1, %c0_2] : memref<256x128xbf16, #tpu.memory_space<vmem>>, vector<256x128xbf16>
    %cst = arith.constant dense<0.000000e+00> : vector<32x256xf32>
    %3 = tpu.matmul %1, %2, %cst {dimension_numbers = #tpu.dot_dimension_numbers<[1], [1], [0], [0], [0, 0, 1, 0], [], []>} : vector<32x128xbf16>, vector<256x128xbf16>, vector<32x256xf32> -> vector<32x256xf32>
    %c0_3 = arith.constant 0 : index
    %c0_4 = arith.constant 0 : index
    %4 = vector.load %arg3[%c0_3, %c0_4] : memref<1x256xf32, #tpu.memory_space<vmem>>, vector<1x256xf32>
    %5 = vector.broadcast %4 : vector<1x256xf32> to vector<32x256xf32>
    %6 = arith.addf %3, %5 : vector<32x256xf32>
    %7 = vector.extract_strided_slice %6 {offsets = [0, 0], sizes = [32, 128], strides = [1, 1]} : vector<32x256xf32> to vector<32x128xf32>
    %8 = arith.truncf %7 : vector<32x128xf32> to vector<32x128xbf16>
    %c0_5 = arith.constant 0 : index
    %c0_6 = arith.constant 0 : index
    %9 = vector.load %arg4[%c0_5, %c0_6] : memref<32x128xbf16, #tpu.memory_space<vmem>>, vector<32x128xbf16>
    tpu.vector_store %arg4[%c0_5, %c0_6], %8 {strides = array<i32>} : memref<32x128xbf16, #tpu.memory_space<vmem>>, vector<32x128xbf16>,
    %10 = vector.extract_strided_slice %6 {offsets = [0, 128], sizes = [32, 128], strides = [1, 1]} : vector<32x256xf32> to vector<32x128xf32>
    %11 = arith.truncf %10 : vector<32x128xf32> to vector<32x128xbf16>
    %c0_7 = arith.constant 0 : index
    %c0_8 = arith.constant 0 : index
    %12 = vector.load %arg5[%c0_7, %c0_8] : memref<32x128xbf16, #tpu.memory_space<vmem>>, vector<32x128xbf16>
    tpu.vector_store %arg5[%c0_7, %c0_8], %11 {strides = array<i32>} : memref<32x128xbf16, #tpu.memory_space<vmem>>, vector<32x128xbf16>,
    return
  }
  func.func @transform_0(%arg0: i32) -> (i32, i32) {
    %c0_i32 = arith.constant 0 : i32
    %c0_i32_0 = arith.constant 0 : i32
    return %arg0, %c0_i32 : i32, i32
  }
  func.func @transform_1(%arg0: i32) -> (i32, i32) {
    %c0_i32 = arith.constant 0 : i32
    %c0_i32_0 = arith.constant 0 : i32
    %c0_i32_1 = arith.constant 0 : i32
    return %c0_i32, %c0_i32_0 : i32, i32
  }
  func.func @transform_2(%arg0: i32) -> (i32, i32) {
    %c0_i32 = arith.constant 0 : i32
    %c0_i32_0 = arith.constant 0 : i32
    %c0_i32_1 = arith.constant 0 : i32
    return %c0_i32, %c0_i32_0 : i32, i32
  }
  func.func @transform_3(%arg0: i32) -> (i32, i32) {
    %c0_i32 = arith.constant 0 : i32
    %c0_i32_0 = arith.constant 0 : i32
    return %arg0, %c0_i32 : i32, i32
  }
  func.func @transform_4(%arg0: i32) -> (i32, i32) {
    %c0_i32 = arith.constant 0 : i32
    %c0_i32_0 = arith.constant 0 : i32
    return %arg0, %c0_i32 : i32, i32
  }
}

module attributes {stable_mosaic.version = 11 : i64} {
  func.func @_attn_kernel(%arg0: i32, %arg1: i32, %arg2: i32, %arg3: memref<1x1x16x64xbf16, #tpu.memory_space<vmem>>, %arg4: memref<1x1x16x64xbf16, #tpu.memory_space<vmem>>, %arg5: memref<1x1x16x64xbf16, #tpu.memory_space<vmem>>, %arg6: memref<128x64xbf16, #tpu.memory_space<vmem>>, %arg7: memref<1x1x16x64xbf16, #tpu.memory_space<vmem>>) attributes {dimension_semantics = [#tpu.dimension_semantics<parallel>, #tpu.dimension_semantics<parallel>, #tpu.dimension_semantics<parallel>], iteration_bounds = array<i64: 2, 2, 1>, scalar_prefetch = 0 : i64, scratch_operands = 0 : i64, tpu.core_type = #tpu.core_type<tc>, window_params = [{transform_indices = @transform_0, window_bounds = array<i64: 1, 1, 16, 64>}, {transform_indices = @transform_1, window_bounds = array<i64: 1, 1, 16, 64>}, {transform_indices = @transform_2, window_bounds = array<i64: 1, 1, 16, 64>}, {pipeline_mode = #tpu.pipeline_mode<synchronous>, transform_indices = @transform_3, window_bounds = array<i64: 128, 64>}, {transform_indices = @transform_4, window_bounds = array<i64: 1, 1, 16, 64>}]} {
    %c16_i32 = arith.constant 16 : i32
    %0 = arith.muli %arg2, %c16_i32 : i32
    %c0 = arith.constant 0 : index
    %c0_0 = arith.constant 0 : index
    %c0_1 = arith.constant 0 : index
    %c0_2 = arith.constant 0 : index
    %1 = vector.load %arg3[%c0, %c0_0, %c0_1, %c0_2] : memref<1x1x16x64xbf16, #tpu.memory_space<vmem>>, vector<1x1x16x64xbf16>
    %2 = vector.shape_cast %1 : vector<1x1x16x64xbf16> to vector<16x64xbf16>
    %c0_3 = arith.constant 0 : index
    %c0_4 = arith.constant 0 : index
    %c0_5 = arith.constant 0 : index
    %c0_6 = arith.constant 0 : index
    %3 = vector.load %arg4[%c0_3, %c0_4, %c0_5, %c0_6] : memref<1x1x16x64xbf16, #tpu.memory_space<vmem>>, vector<1x1x16x64xbf16>
    %4 = vector.shape_cast %3 : vector<1x1x16x64xbf16> to vector<16x64xbf16>
    %c0_7 = arith.constant 0 : index
    %c0_8 = arith.constant 0 : index
    %c0_9 = arith.constant 0 : index
    %c0_10 = arith.constant 0 : index
    %5 = vector.load %arg5[%c0_7, %c0_8, %c0_9, %c0_10] : memref<1x1x16x64xbf16, #tpu.memory_space<vmem>>, vector<1x1x16x64xbf16>
    %6 = vector.shape_cast %5 : vector<1x1x16x64xbf16> to vector<16x64xbf16>
    %c0_11 = arith.constant 0 : index
    %c0_12 = arith.constant 0 : index
    %7 = vector.load %arg6[%c0_11, %c0_12] : memref<128x64xbf16, #tpu.memory_space<vmem>>, vector<128x64xbf16>
    %cst = arith.constant dense<0.000000e+00> : vector<16x128xf32>
    %8 = tpu.matmul %2, %7, %cst {dimension_numbers = #tpu.dot_dimension_numbers<[1], [1], [0], [0], [0, 0, 1, 0], [], []>} : vector<16x64xbf16>, vector<128x64xbf16>, vector<16x128xf32> -> vector<16x128xf32>
    %9 = tpu.dynamic_rotate %8 by %0 dim 1 {stride = 1 : si32, stride_dimension = 0 : si32} : vector<16x128xf32>, i32 -> vector<16x128xf32>
    %c113_i32 = arith.constant 113 : i32
    %10 = tpu.dynamic_rotate %9 by %c113_i32 dim 1 : vector<16x128xf32>, i32 -> vector<16x128xf32>
    %11 = tpu.iota {dimensions = array<i32: 0>} : vector<16x128xi32>
    %12 = vector.broadcast %0 : i32 to vector<16x128xi32>
    %13 = arith.addi %12, %11 : vector<16x128xi32>
    %14 = tpu.iota {dimensions = array<i32: 1>} : vector<16x128xi32>
    %15 = arith.cmpi sle, %14, %13 : vector<16x128xi32>
    %cst_13 = arith.constant 0.000000e+00 : f32
    %16 = vector.broadcast %cst_13 : f32 to vector<16x128xf32>
    %17 = arith.select %15, %10, %16 : vector<16x128xi1>, vector<16x128xf32>
    %cst_14 = arith.constant dense<0.000000e+00> : vector<16x16xf32>
    %18 = tpu.matmul %2, %4, %cst_14 {dimension_numbers = #tpu.dot_dimension_numbers<[1], [1], [0], [0], [0, 0, 1, 0], [], []>} : vector<16x64xbf16>, vector<16x64xbf16>, vector<16x16xf32> -> vector<16x16xf32>
    %19 = vector.extract_strided_slice %17 {offsets = [0, 0], sizes = [16, 16], strides = [1, 1]} : vector<16x128xf32> to vector<16x16xf32>
    %20 = arith.addf %18, %19 : vector<16x16xf32>
    %cst_15 = arith.constant dense<0xFF800000> : vector<16xf32>
    %21 = vector.multi_reduction <maximumf>, %20, %cst_15 [1] : vector<16x16xf32> to vector<16xf32>
    %22 = vector.shape_cast %21 : vector<16xf32> to vector<16x1xf32>
    %23 = vector.broadcast %22 : vector<16x1xf32> to vector<16x16xf32>
    %24 = arith.subf %20, %23 : vector<16x16xf32>
    %25 = math.exp %24 : vector<16x16xf32>
    %cst_16 = arith.constant dense<0.000000e+00> : vector<16xf32>
    %26 = vector.multi_reduction <add>, %25, %cst_16 [1] : vector<16x16xf32> to vector<16xf32>
    %27 = vector.shape_cast %26 : vector<16xf32> to vector<16x1xf32>
    %28 = tpu.reciprocal %27 {approx = true} : vector<16x1xf32> -> vector<16x1xf32>
    %29 = vector.broadcast %28 : vector<16x1xf32> to vector<16x16xf32>
    %30 = arith.mulf %25, %29 : vector<16x16xf32>
    %31 = arith.truncf %30 : vector<16x16xf32> to vector<16x16xbf16>
    %cst_17 = arith.constant dense<0.000000e+00> : vector<16x64xf32>
    %32 = tpu.matmul %31, %6, %cst_17 {dimension_numbers = #tpu.dot_dimension_numbers<[1], [0], [0], [1], [0, 0, 1, 1], [], []>} : vector<16x16xbf16>, vector<16x64xbf16>, vector<16x64xf32> -> vector<16x64xf32>
    %33 = arith.truncf %32 : vector<16x64xf32> to vector<16x64xbf16>
    %c0_18 = arith.constant 0 : index
    %c0_19 = arith.constant 0 : index
    %c0_20 = arith.constant 0 : index
    %c0_21 = arith.constant 0 : index
    %34 = vector.load %arg7[%c0_18, %c0_19, %c0_20, %c0_21] : memref<1x1x16x64xbf16, #tpu.memory_space<vmem>>, vector<1x1x16x64xbf16>
    %35 = vector.shape_cast %34 : vector<1x1x16x64xbf16> to vector<16x64xbf16>
    %36 = vector.shape_cast %33 : vector<16x64xbf16> to vector<1x1x16x64xbf16>
    tpu.vector_store %arg7[%c0_18, %c0_19, %c0_20, %c0_21], %36 {strides = array<i32>} : memref<1x1x16x64xbf16, #tpu.memory_space<vmem>>, vector<1x1x16x64xbf16>,
    return
  }
  func.func @transform_0(%arg0: i32, %arg1: i32, %arg2: i32) -> (i32, i32, i32, i32) {
    %c0_i32 = arith.constant 0 : i32
    %c0_i32_0 = arith.constant 0 : i32
    return %arg0, %arg1, %arg2, %c0_i32 : i32, i32, i32, i32
  }
  func.func @transform_1(%arg0: i32, %arg1: i32, %arg2: i32) -> (i32, i32, i32, i32) {
    %c0_i32 = arith.constant 0 : i32
    %c0_i32_0 = arith.constant 0 : i32
    %c0_i32_1 = arith.constant 0 : i32
    return %arg0, %arg1, %c0_i32, %c0_i32_0 : i32, i32, i32, i32
  }
  func.func @transform_2(%arg0: i32, %arg1: i32, %arg2: i32) -> (i32, i32, i32, i32) {
    %c0_i32 = arith.constant 0 : i32
    %c0_i32_0 = arith.constant 0 : i32
    %c0_i32_1 = arith.constant 0 : i32
    return %arg0, %arg1, %c0_i32, %c0_i32_0 : i32, i32, i32, i32
  }
  func.func @transform_3(%arg0: i32, %arg1: i32, %arg2: i32) -> (i32, i32) {
    %c0_i32 = arith.constant 0 : i32
    %c0_i32_0 = arith.constant 0 : i32
    %c0_i32_1 = arith.constant 0 : i32
    return %c0_i32, %c0_i32_0 : i32, i32
  }
  func.func @transform_4(%arg0: i32, %arg1: i32, %arg2: i32) -> (i32, i32, i32, i32) {
    %c0_i32 = arith.constant 0 : i32
    %c0_i32_0 = arith.constant 0 : i32
    return %arg0, %arg1, %arg2, %c0_i32 : i32, i32, i32, i32
  }
}

module attributes {stable_mosaic.version = 11 : i64} {
  func.func @_ffn_ln_kernel(%arg0: i32, %arg1: memref<32x128xf32, #tpu.memory_space<vmem>>, %arg2: memref<64x128xbf16, #tpu.memory_space<vmem>>, %arg3: memref<1x64xf32, #tpu.memory_space<vmem>>, %arg4: memref<128x64xbf16, #tpu.memory_space<vmem>>, %arg5: memref<1x128xf32, #tpu.memory_space<vmem>>, %arg6: memref<1x128xf32, #tpu.memory_space<vmem>>, %arg7: memref<1x128xf32, #tpu.memory_space<vmem>>, %arg8: memref<32x128xf32, #tpu.memory_space<vmem>>) attributes {dimension_semantics = [#tpu.dimension_semantics<parallel>], iteration_bounds = array<i64: 1>, scalar_prefetch = 0 : i64, scratch_operands = 0 : i64, tpu.core_type = #tpu.core_type<tc>, window_params = [{transform_indices = @transform_0, window_bounds = array<i64: 32, 128>}, {pipeline_mode = #tpu.pipeline_mode<synchronous>, transform_indices = @transform_1, window_bounds = array<i64: 64, 128>}, {pipeline_mode = #tpu.pipeline_mode<synchronous>, transform_indices = @transform_2, window_bounds = array<i64: 1, 64>}, {pipeline_mode = #tpu.pipeline_mode<synchronous>, transform_indices = @transform_3, window_bounds = array<i64: 128, 64>}, {pipeline_mode = #tpu.pipeline_mode<synchronous>, transform_indices = @transform_4, window_bounds = array<i64: 1, 128>}, {pipeline_mode = #tpu.pipeline_mode<synchronous>, transform_indices = @transform_5, window_bounds = array<i64: 1, 128>}, {pipeline_mode = #tpu.pipeline_mode<synchronous>, transform_indices = @transform_6, window_bounds = array<i64: 1, 128>}, {transform_indices = @transform_7, window_bounds = array<i64: 32, 128>}]} {
    %c0 = arith.constant 0 : index
    %c0_0 = arith.constant 0 : index
    %0 = vector.load %arg1[%c0, %c0_0] : memref<32x128xf32, #tpu.memory_space<vmem>>, vector<32x128xf32>
    %1 = arith.truncf %0 : vector<32x128xf32> to vector<32x128xbf16>
    %c0_1 = arith.constant 0 : index
    %c0_2 = arith.constant 0 : index
    %2 = vector.load %arg2[%c0_1, %c0_2] : memref<64x128xbf16, #tpu.memory_space<vmem>>, vector<64x128xbf16>
    %cst = arith.constant dense<0.000000e+00> : vector<32x64xf32>
    %3 = tpu.matmul %1, %2, %cst {dimension_numbers = #tpu.dot_dimension_numbers<[1], [1], [0], [0], [0, 0, 1, 0], [], []>} : vector<32x128xbf16>, vector<64x128xbf16>, vector<32x64xf32> -> vector<32x64xf32>
    %c0_3 = arith.constant 0 : index
    %c0_4 = arith.constant 0 : index
    %4 = vector.load %arg3[%c0_3, %c0_4] : memref<1x64xf32, #tpu.memory_space<vmem>>, vector<1x64xf32>
    %5 = vector.broadcast %4 : vector<1x64xf32> to vector<32x64xf32>
    %6 = arith.addf %3, %5 : vector<32x64xf32>
    %cst_5 = arith.constant 0.000000e+00 : f32
    %7 = vector.broadcast %cst_5 : f32 to vector<32x64xf32>
    %8 = arith.maximumf %6, %7 : vector<32x64xf32>
    %9 = arith.truncf %8 : vector<32x64xf32> to vector<32x64xbf16>
    %c0_6 = arith.constant 0 : index
    %c0_7 = arith.constant 0 : index
    %10 = vector.load %arg4[%c0_6, %c0_7] : memref<128x64xbf16, #tpu.memory_space<vmem>>, vector<128x64xbf16>
    %cst_8 = arith.constant dense<0.000000e+00> : vector<32x128xf32>
    %11 = tpu.matmul %9, %10, %cst_8 {dimension_numbers = #tpu.dot_dimension_numbers<[1], [1], [0], [0], [0, 0, 1, 0], [], []>} : vector<32x64xbf16>, vector<128x64xbf16>, vector<32x128xf32> -> vector<32x128xf32>
    %c0_9 = arith.constant 0 : index
    %c0_10 = arith.constant 0 : index
    %12 = vector.load %arg5[%c0_9, %c0_10] : memref<1x128xf32, #tpu.memory_space<vmem>>, vector<1x128xf32>
    %13 = vector.broadcast %12 : vector<1x128xf32> to vector<32x128xf32>
    %14 = arith.addf %11, %13 : vector<32x128xf32>
    %15 = arith.addf %14, %0 : vector<32x128xf32>
    %c0_11 = arith.constant 0 : index
    %c0_12 = arith.constant 0 : index
    %16 = vector.load %arg6[%c0_11, %c0_12] : memref<1x128xf32, #tpu.memory_space<vmem>>, vector<1x128xf32>
    %c0_13 = arith.constant 0 : index
    %c0_14 = arith.constant 0 : index
    %17 = vector.load %arg7[%c0_13, %c0_14] : memref<1x128xf32, #tpu.memory_space<vmem>>, vector<1x128xf32>
    %cst_15 = arith.constant dense<0.000000e+00> : vector<32xf32>
    %18 = vector.multi_reduction <add>, %15, %cst_15 [1] : vector<32x128xf32> to vector<32xf32>
    %19 = vector.shape_cast %18 : vector<32xf32> to vector<32x1xf32>
    %cst_16 = arith.constant 1.280000e+02 : f32
    %20 = vector.broadcast %cst_16 : f32 to vector<32x1xf32>
    %21 = arith.divf %19, %20 : vector<32x1xf32>
    %22 = vector.broadcast %21 : vector<32x1xf32> to vector<32x128xf32>
    %23 = arith.subf %15, %22 : vector<32x128xf32>
    %24 = arith.mulf %23, %23 : vector<32x128xf32>
    %cst_17 = arith.constant dense<0.000000e+00> : vector<32xf32>
    %25 = vector.multi_reduction <add>, %24, %cst_17 [1] : vector<32x128xf32> to vector<32xf32>
    %26 = vector.shape_cast %25 : vector<32xf32> to vector<32x1xf32>
    %cst_18 = arith.constant 1.280000e+02 : f32
    %27 = vector.broadcast %cst_18 : f32 to vector<32x1xf32>
    %28 = arith.divf %26, %27 : vector<32x1xf32>
    %29 = vector.broadcast %21 : vector<32x1xf32> to vector<32x128xf32>
    %30 = arith.subf %15, %29 : vector<32x128xf32>
    %cst_19 = arith.constant 9.99999997E-7 : f32
    %31 = vector.broadcast %cst_19 : f32 to vector<32x1xf32>
    %32 = arith.addf %28, %31 : vector<32x1xf32>
    %33 = math.rsqrt %32 : vector<32x1xf32>
    %34 = vector.broadcast %33 : vector<32x1xf32> to vector<32x128xf32>
    %35 = arith.mulf %30, %34 : vector<32x128xf32>
    %36 = vector.broadcast %16 : vector<1x128xf32> to vector<32x128xf32>
    %37 = arith.mulf %35, %36 : vector<32x128xf32>
    %38 = vector.broadcast %17 : vector<1x128xf32> to vector<32x128xf32>
    %39 = arith.addf %37, %38 : vector<32x128xf32>
    %c0_20 = arith.constant 0 : index
    %c0_21 = arith.constant 0 : index
    %40 = vector.load %arg8[%c0_20, %c0_21] : memref<32x128xf32, #tpu.memory_space<vmem>>, vector<32x128xf32>
    tpu.vector_store %arg8[%c0_20, %c0_21], %39 {strides = array<i32>} : memref<32x128xf32, #tpu.memory_space<vmem>>, vector<32x128xf32>,
    return
  }
  func.func @transform_0(%arg0: i32) -> (i32, i32) {
    %c0_i32 = arith.constant 0 : i32
    %c0_i32_0 = arith.constant 0 : i32
    return %arg0, %c0_i32 : i32, i32
  }
  func.func @transform_1(%arg0: i32) -> (i32, i32) {
    %c0_i32 = arith.constant 0 : i32
    %c0_i32_0 = arith.constant 0 : i32
    %c0_i32_1 = arith.constant 0 : i32
    return %c0_i32, %c0_i32_0 : i32, i32
  }
  func.func @transform_2(%arg0: i32) -> (i32, i32) {
    %c0_i32 = arith.constant 0 : i32
    %c0_i32_0 = arith.constant 0 : i32
    %c0_i32_1 = arith.constant 0 : i32
    return %c0_i32, %c0_i32_0 : i32, i32
  }
  func.func @transform_3(%arg0: i32) -> (i32, i32) {
    %c0_i32 = arith.constant 0 : i32
    %c0_i32_0 = arith.constant 0 : i32
    %c0_i32_1 = arith.constant 0 : i32
    return %c0_i32, %c0_i32_0 : i32, i32
  }
  func.func @transform_4(%arg0: i32) -> (i32, i32) {
    %c0_i32 = arith.constant 0 : i32
    %c0_i32_0 = arith.constant 0 : i32
    %c0_i32_1 = arith.constant 0 : i32
    return %c0_i32, %c0_i32_0 : i32, i32
  }
  func.func @transform_5(%arg0: i32) -> (i32, i32) {
    %c0_i32 = arith.constant 0 : i32
    %c0_i32_0 = arith.constant 0 : i32
    %c0_i32_1 = arith.constant 0 : i32
    return %c0_i32, %c0_i32_0 : i32, i32
  }
  func.func @transform_6(%arg0: i32) -> (i32, i32) {
    %c0_i32 = arith.constant 0 : i32
    %c0_i32_0 = arith.constant 0 : i32
    %c0_i32_1 = arith.constant 0 : i32
    return %c0_i32, %c0_i32_0 : i32, i32
  }
  func.func @transform_7(%arg0: i32) -> (i32, i32) {
    %c0_i32 = arith.constant 0 : i32
    %c0_i32_0 = arith.constant 0 : i32
    return %arg0, %c0_i32 : i32, i32
  }
}

module attributes {stable_mosaic.version = 11 : i64} {
  func.func @_ffn_ln_kernel(%arg0: i32, %arg1: memref<32x128xf32, #tpu.memory_space<vmem>>, %arg2: memref<64x128xbf16, #tpu.memory_space<vmem>>, %arg3: memref<1x64xf32, #tpu.memory_space<vmem>>, %arg4: memref<128x64xbf16, #tpu.memory_space<vmem>>, %arg5: memref<1x128xf32, #tpu.memory_space<vmem>>, %arg6: memref<1x128xf32, #tpu.memory_space<vmem>>, %arg7: memref<1x128xf32, #tpu.memory_space<vmem>>, %arg8: memref<32x128xf32, #tpu.memory_space<vmem>>) attributes {dimension_semantics = [#tpu.dimension_semantics<parallel>], iteration_bounds = array<i64: 1>, scalar_prefetch = 0 : i64, scratch_operands = 0 : i64, tpu.core_type = #tpu.core_type<tc>, window_params = [{transform_indices = @transform_0, window_bounds = array<i64: 32, 128>}, {pipeline_mode = #tpu.pipeline_mode<synchronous>, transform_indices = @transform_1, window_bounds = array<i64: 64, 128>}, {pipeline_mode = #tpu.pipeline_mode<synchronous>, transform_indices = @transform_2, window_bounds = array<i64: 1, 64>}, {pipeline_mode = #tpu.pipeline_mode<synchronous>, transform_indices = @transform_3, window_bounds = array<i64: 128, 64>}, {pipeline_mode = #tpu.pipeline_mode<synchronous>, transform_indices = @transform_4, window_bounds = array<i64: 1, 128>}, {pipeline_mode = #tpu.pipeline_mode<synchronous>, transform_indices = @transform_5, window_bounds = array<i64: 1, 128>}, {pipeline_mode = #tpu.pipeline_mode<synchronous>, transform_indices = @transform_6, window_bounds = array<i64: 1, 128>}, {transform_indices = @transform_7, window_bounds = array<i64: 32, 128>}]} {
    %c0 = arith.constant 0 : index
    %c0_0 = arith.constant 0 : index
    %0 = vector.load %arg1[%c0, %c0_0] : memref<32x128xf32, #tpu.memory_space<vmem>>, vector<32x128xf32>
    %1 = arith.truncf %0 : vector<32x128xf32> to vector<32x128xbf16>
    %c0_1 = arith.constant 0 : index
    %c0_2 = arith.constant 0 : index
    %2 = vector.load %arg2[%c0_1, %c0_2] : memref<64x128xbf16, #tpu.memory_space<vmem>>, vector<64x128xbf16>
    %cst = arith.constant dense<0.000000e+00> : vector<32x64xf32>
    %3 = tpu.matmul %1, %2, %cst {dimension_numbers = #tpu.dot_dimension_numbers<[1], [1], [0], [0], [0, 0, 1, 0], [], []>} : vector<32x128xbf16>, vector<64x128xbf16>, vector<32x64xf32> -> vector<32x64xf32>
    %c0_3 = arith.constant 0 : index
    %c0_4 = arith.constant 0 : index
    %4 = vector.load %arg3[%c0_3, %c0_4] : memref<1x64xf32, #tpu.memory_space<vmem>>, vector<1x64xf32>
    %5 = vector.broadcast %4 : vector<1x64xf32> to vector<32x64xf32>
    %6 = arith.addf %3, %5 : vector<32x64xf32>
    %cst_5 = arith.constant 0.000000e+00 : f32
    %7 = vector.broadcast %cst_5 : f32 to vector<32x64xf32>
    %8 = arith.maximumf %6, %7 : vector<32x64xf32>
    %9 = arith.truncf %8 : vector<32x64xf32> to vector<32x64xbf16>
    %c0_6 = arith.constant 0 : index
    %c0_7 = arith.constant 0 : index
    %10 = vector.load %arg4[%c0_6, %c0_7] : memref<128x64xbf16, #tpu.memory_space<vmem>>, vector<128x64xbf16>
    %cst_8 = arith.constant dense<0.000000e+00> : vector<32x128xf32>
    %11 = tpu.matmul %9, %10, %cst_8 {dimension_numbers = #tpu.dot_dimension_numbers<[1], [1], [0], [0], [0, 0, 1, 0], [], []>} : vector<32x64xbf16>, vector<128x64xbf16>, vector<32x128xf32> -> vector<32x128xf32>
    %c0_9 = arith.constant 0 : index
    %c0_10 = arith.constant 0 : index
    %12 = vector.load %arg5[%c0_9, %c0_10] : memref<1x128xf32, #tpu.memory_space<vmem>>, vector<1x128xf32>
    %13 = vector.broadcast %12 : vector<1x128xf32> to vector<32x128xf32>
    %14 = arith.addf %11, %13 : vector<32x128xf32>
    %15 = arith.addf %14, %0 : vector<32x128xf32>
    %c0_11 = arith.constant 0 : index
    %c0_12 = arith.constant 0 : index
    %16 = vector.load %arg6[%c0_11, %c0_12] : memref<1x128xf32, #tpu.memory_space<vmem>>, vector<1x128xf32>
    %c0_13 = arith.constant 0 : index
    %c0_14 = arith.constant 0 : index
    %17 = vector.load %arg7[%c0_13, %c0_14] : memref<1x128xf32, #tpu.memory_space<vmem>>, vector<1x128xf32>
    %cst_15 = arith.constant dense<0.000000e+00> : vector<32xf32>
    %18 = vector.multi_reduction <add>, %15, %cst_15 [1] : vector<32x128xf32> to vector<32xf32>
    %19 = vector.shape_cast %18 : vector<32xf32> to vector<32x1xf32>
    %cst_16 = arith.constant 1.280000e+02 : f32
    %20 = vector.broadcast %cst_16 : f32 to vector<32x1xf32>
    %21 = arith.divf %19, %20 : vector<32x1xf32>
    %22 = vector.broadcast %21 : vector<32x1xf32> to vector<32x128xf32>
    %23 = arith.subf %15, %22 : vector<32x128xf32>
    %24 = arith.mulf %23, %23 : vector<32x128xf32>
    %cst_17 = arith.constant dense<0.000000e+00> : vector<32xf32>
    %25 = vector.multi_reduction <add>, %24, %cst_17 [1] : vector<32x128xf32> to vector<32xf32>
    %26 = vector.shape_cast %25 : vector<32xf32> to vector<32x1xf32>
    %cst_18 = arith.constant 1.280000e+02 : f32
    %27 = vector.broadcast %cst_18 : f32 to vector<32x1xf32>
    %28 = arith.divf %26, %27 : vector<32x1xf32>
    %29 = vector.broadcast %21 : vector<32x1xf32> to vector<32x128xf32>
    %30 = arith.subf %15, %29 : vector<32x128xf32>
    %cst_19 = arith.constant 9.99999997E-7 : f32
    %31 = vector.broadcast %cst_19 : f32 to vector<32x1xf32>
    %32 = arith.addf %28, %31 : vector<32x1xf32>
    %33 = math.rsqrt %32 : vector<32x1xf32>
    %34 = vector.broadcast %33 : vector<32x1xf32> to vector<32x128xf32>
    %35 = arith.mulf %30, %34 : vector<32x128xf32>
    %36 = vector.broadcast %16 : vector<1x128xf32> to vector<32x128xf32>
    %37 = arith.mulf %35, %36 : vector<32x128xf32>
    %38 = vector.broadcast %17 : vector<1x128xf32> to vector<32x128xf32>
    %39 = arith.addf %37, %38 : vector<32x128xf32>
    %c0_20 = arith.constant 0 : index
    %c0_21 = arith.constant 0 : index
    %40 = vector.load %arg8[%c0_20, %c0_21] : memref<32x128xf32, #tpu.memory_space<vmem>>, vector<32x128xf32>
    tpu.vector_store %arg8[%c0_20, %c0_21], %39 {strides = array<i32>} : memref<32x128xf32, #tpu.memory_space<vmem>>, vector<32x128xf32>,
    return
  }
  func.func @transform_0(%arg0: i32) -> (i32, i32) {
    %c0_i32 = arith.constant 0 : i32
    %c0_i32_0 = arith.constant 0 : i32
    return %arg0, %c0_i32 : i32, i32
  }
  func.func @transform_1(%arg0: i32) -> (i32, i32) {
    %c0_i32 = arith.constant 0 : i32
    %c0_i32_0 = arith.constant 0 : i32
    %c0_i32_1 = arith.constant 0 : i32
    return %c0_i32, %c0_i32_0 : i32, i32
  }
  func.func @transform_2(%arg0: i32) -> (i32, i32) {
    %c0_i32 = arith.constant 0 : i32
    %c0_i32_0 = arith.constant 0 : i32
    %c0_i32_1 = arith.constant 0 : i32
    return %c0_i32, %c0_i32_0 : i32, i32
  }
  func.func @transform_3(%arg0: i32) -> (i32, i32) {
    %c0_i32 = arith.constant 0 : i32
    %c0_i32_0 = arith.constant 0 : i32
    %c0_i32_1 = arith.constant 0 : i32
    return %c0_i32, %c0_i32_0 : i32, i32
  }
  func.func @transform_4(%arg0: i32) -> (i32, i32) {
    %c0_i32 = arith.constant 0 : i32
    %c0_i32_0 = arith.constant 0 : i32
    %c0_i32_1 = arith.constant 0 : i32
    return %c0_i32, %c0_i32_0 : i32, i32
  }
  func.func @transform_5(%arg0: i32) -> (i32, i32) {
    %c0_i32 = arith.constant 0 : i32
    %c0_i32_0 = arith.constant 0 : i32
    %c0_i32_1 = arith.constant 0 : i32
    return %c0_i32, %c0_i32_0 : i32, i32
  }
  func.func @transform_6(%arg0: i32) -> (i32, i32) {
    %c0_i32 = arith.constant 0 : i32
    %c0_i32_0 = arith.constant 0 : i32
    %c0_i32_1 = arith.constant 0 : i32
    return %c0_i32, %c0_i32_0 : i32, i32
  }
  func.func @transform_7(%arg0: i32) -> (i32, i32) {
    %c0_i32 = arith.constant 0 : i32
    %c0_i32_0 = arith.constant 0 : i32
    return %arg0, %c0_i32 : i32, i32
  }
}

</mosaic_0001>

<bundles_post_ra>
// kernel: _decoder_core.18
= control target key start
LH: loop header
LB: loop body
LE: loop exit
PB: predicated region body
PF: predicated region fallthrough
CT: control target
= control target key end

     0   :  { %s402_s1 = inlined_call_operand.vmem [shape: bf16[128,128], index: 1, kind: input, shape index: {}]   ;;  %s403_s0 = inlined_call_operand.vmem [shape: bf16[32,128], index: 0, kind: input, shape index: {}]   ;;  %s404_s2 = inlined_call_operand.vmem [shape: f32[1,128], index: 2, kind: input, shape index: {}]   ;;  %s405_s3 = inlined_call_operand.vmem [shape: f32[32,128], index: 3, kind: input, shape index: {}]   ;;  %s406_s4 = inlined_call_operand.vmem [shape: f32[1,128], index: 4, kind: input, shape index: {}]   ;;  %s407_s5 = inlined_call_operand.vmem [shape: f32[1,128], index: 5, kind: input, shape index: {}]   ;;  %s408_s6 = inlined_call_operand.vmem [shape: f32[32,128], index: 6, kind: output, shape index: {}]  }
   0x1   :  { %v286_v0 = vld [vmem:[%s402_s1 + $0x38] sm:$0xff]   ;;  %v287_v1 = vld [vmem:[%s402_s1 + $0x30] sm:$0xff]   ;;  %v288_v2 = vld [vmem:[%s402_s1 + $0x28] sm:$0xff]  }
   0x2   :  { %266 = vmatprep.subr.bf16.mxu0 %v286_v0  ;;  %v294_v3 = vld [vmem:[%s403_s0] sm:$0xff]   ;;  %v290_v5 = vld [vmem:[%s402_s1 + $0x18] sm:$0xff]   ;;  %v291_v6 = vld [vmem:[%s402_s1 + $0x10] sm:$0xff]  }
   0x3   :  { %267 = vmatpush3.bf16.xpose.msra.mxu0 %v286_v0  ;;  %282 = vmatprep.mubr.bf16.mxu0 %v294_v3  ;;  %v289_v4 = vld [vmem:[%s402_s1 + $0x20] sm:$0xff]   ;;  %v292_v7 = vld [vmem:[%s402_s1 + $0x8] sm:$0xff]   ;;  %v162_v12 = vld [vmem:[%s405_s3 + $0x10] sm:$0xff] }
   0x4   :  { %268 = vmatprep.subr.bf16.mxu0 %v287_v1  ;;  %v293_v8 = vld [vmem:[%s402_s1] sm:$0xff]   ;;  %v295_v9 = vld [vmem:[%s403_s0 + $0x8] sm:$0xff]   ;;  %v163_v19 = vld [vmem:[%s405_s3 + $0x18] sm:$0xff] }
   0x5   :  { %v243_v10 = vld [vmem:[%s404_s2] ss:$0 sm:$0xff]  ;;  %v161_v23 = vld [vmem:[%s405_s3 + $0x8] sm:$0xff] }
   0x6   :  { %v160_v15 = vld [vmem:[%s405_s3] sm:$0xff] }
   0x7   :  { %v254_v56 = vld [vmem:[%s406_s4] ss:$0 sm:$0xff] }
   0x8   :  { %v255_v58 = vld [vmem:[%s407_s5] ss:$0 sm:$0xff] }
   0xb   :  { %269 = vmatpush3.bf16.xpose.msra.mxu0 %v287_v1 }
   0xc   :  { %270 = vmatprep.subr.bf16.mxu0 %v288_v2 }
  0x13   :  { %271 = vmatpush3.bf16.xpose.msra.mxu0 %v288_v2 }
  0x14   :  { %272 = vmatprep.subr.bf16.mxu0 %v289_v4 }
  0x1b   :  { %273 = vmatpush3.bf16.xpose.msra.mxu0 %v289_v4 }
  0x1c   :  { %274 = vmatprep.subr.bf16.mxu0 %v290_v5 }
  0x23   :  { %275 = vmatpush3.bf16.xpose.msra.mxu0 %v290_v5 }
  0x24   :  { %276 = vmatprep.subr.bf16.mxu0 %v291_v6 }
  0x2b   :  { %277 = vmatpush3.bf16.xpose.msra.mxu0 %v291_v6 }
  0x2c   :  { %278 = vmatprep.subr.bf16.mxu0 %v292_v7 }
  0x33   :  { %279 = vmatpush3.bf16.xpose.msra.mxu0 %v292_v7 }
  0x34   :  { %280 = vmatprep.subr.bf16.mxu0 %v293_v8 }
  0x3b   :  { %281 = vmatpush3.bf16.xpose.msra.mxu0 %v293_v8 }
  0x42   :  { %283 = vmatmul.mubr.bf16.vlgmr.msra.gmra.mxu0 %v295_v9 }
 0x102   :  { %v284_v11 = vpop.f32.mrf.mxu0 }
 0x103   :  { %v154_v13 = vadd.f32 %v284_v11, %v243_v10 }
 0x104   :  { %v145_v14 = vpop.f32.mrf.mxu0 }
 0x105   :  { %v146_v16 = vadd.f32 %v243_v10, %v145_v14  ;;  %v166_v17 = vadd.f32 %v162_v12, %v154_v13 }
 0x106   :  { %v285_v18 = vpop.f32.mrf.mxu0 }
 0x107   :  { %v157_v20 = vadd.f32 %v285_v18, %v243_v10  ;;  %174 = vadd.xlane.f32.xlu1 %v166_v17  ;;  %v164_v21 = vadd.f32 %v160_v15, %v146_v16 }
 0x108   :  { %v148_v22 = vpop.f32.mrf.mxu0 }
 0x109   :  { %v149_v24 = vadd.f32 %v243_v10, %v148_v22  ;;  %170 = vadd.xlane.f32.xlu0 %v164_v21  ;;  %v167_v25 = vadd.f32 %v163_v19, %v157_v20 }
 0x10b   :  { %176 = vadd.xlane.f32.xlu1 %v167_v25  ;;  %v165_v26 = vadd.f32 %v161_v23, %v149_v24 }
 0x10d   :  { %172 = vadd.xlane.f32.xlu0 %v165_v26 }
 0x190   :  { %v175_v27 = vpop.xlane.xlu1 %174 }
 0x191   :  { %v181_v29 = vmul.f32 0.0078125, %v175_v27 }
 0x192   :  { %v171_v28 = vpop.xlane.xlu0 %170 }
 0x193   :  { %v179_v30 = vmul.f32 0.0078125, %v171_v28  ;;  %v185_v34 = vsub.f32 %v166_v17, %v181_v29 }
 0x194   :  { %v177_v31 = vpop.xlane.xlu1 %176 }
 0x195   :  { %v183_v32 = vsub.f32 %v164_v21, %v179_v30  ;;  %v182_v35 = vmul.f32 0.0078125, %v177_v31  ;;  %v189_v40 = vmul.f32 %v185_v34, %v185_v34 }
 0x196   :  { %v173_v33 = vpop.xlane.xlu0 %172 }
 0x197   :  { %v180_v36 = vmul.f32 0.0078125, %v173_v33  ;;  %v187_v37 = vmul.f32 %v183_v32, %v183_v32  ;;  %v186_v39 = vsub.f32 %v167_v25, %v182_v35 }
 0x199   :  { %v184_v38 = vsub.f32 %v165_v26, %v180_v36  ;;  %191 = vadd.xlane.f32.xlu0 %v187_v37  ;;  %v190_v42 = vmul.f32 %v186_v39, %v186_v39 }
 0x19b   :  { %v188_v41 = vmul.f32 %v184_v38, %v184_v38 }
 0x19d   :  { %195 = vadd.xlane.f32.xlu0 %v189_v40  ;;  %193 = vadd.xlane.f32.xlu1 %v188_v41 }
 0x1a1   :  { %197 = vadd.xlane.f32.xlu1 %v190_v42 }
 0x222   :  { %v192_v43 = vpop.xlane.xlu0 %191 }
 0x223   :  { %v199_v44 = vmul.f32 0.0078125, %v192_v43 }
 0x225   :  { %v203_v45 = vadd.f32 1e-06, %v199_v44 }
 0x226   :  { %v194_v46 = vpop.xlane.xlu1 %193  ;;  %v196_v47 = vpop.xlane.xlu0 %195 }
 0x227   :  { %296 = vrsqrt.f32 %v203_v45  ;;  %v200_v48 = vmul.f32 0.0078125, %v194_v46  ;;  %v201_v49 = vmul.f32 0.0078125, %v196_v47 }
 0x229   :  { %v204_v50 = vadd.f32 1e-06, %v200_v48  ;;  %v205_v51 = vadd.f32 1e-06, %v201_v49 }
 0x22a   :  { %v198_v52 = vpop.xlane.xlu1 %197 }
 0x22b   :  { %298 = vrsqrt.f32 %v204_v50  ;;  %v202_v53 = vmul.f32 0.0078125, %v198_v52 }
 0x22c   :  { %300 = vrsqrt.f32 %v205_v51 }
 0x22d   :  { %v206_v54 = vadd.f32 1e-06, %v202_v53 }
 0x22f   :  { %302 = vrsqrt.f32 %v206_v54 }
 0x234   :  { %v297_v55 = vpop.eup %296 }
 0x235   :  { %v211_v57 = vmul.f32 %v297_v55, %v183_v32 }
 0x237   :  { %v221_v59 = vmul.f32 %v254_v56, %v211_v57 }
 0x238   :  { %v299_v60 = vpop.eup %298 }
 0x239   :  { %v301_v61 = vpop.eup %300  ;;  %v231_v62 = vadd.f32 %v255_v58, %v221_v59  ;;  %v212_v63 = vmul.f32 %v299_v60, %v184_v38 }
 0x23a   :  { %v213_v0 = vmul.f32 %v301_v61, %v185_v34 }
 0x23b   :  { %235 = vst [vmem:[%s408_s6] sm:$0xff] %v231_v62  ;;  %v222_v1 = vmul.f32 %v254_v56, %v212_v63 }
 0x23c   :  { %v303_v2 = vpop.eup %302  ;;  %v223_v3 = vmul.f32 %v254_v56, %v213_v0 }
 0x23d   :  { %v232_v4 = vadd.f32 %v255_v58, %v222_v1  ;;  %v214_v5 = vmul.f32 %v303_v2, %v186_v39 }
 0x23e   :  { %v233_v6 = vadd.f32 %v255_v58, %v223_v3 }
 0x23f   :  { %236 = vst [vmem:[%s408_s6 + $0x8] sm:$0xff] %v232_v4  ;;  %v224_v7 = vmul.f32 %v254_v56, %v214_v5 }
 0x240   :  { %237 = vst [vmem:[%s408_s6 + $0x10] sm:$0xff] %v233_v6 }
 0x241   :  { %v234_v8 = vadd.f32 %v255_v58, %v224_v7 }
 0x243   :  { %238 = vst [vmem:[%s408_s6 + $0x18] sm:$0xff] %v234_v8 }

// kernel: _decoder_core.19
= control target key start
LH: loop header
LB: loop body
LE: loop exit
PB: predicated region body
PF: predicated region fallthrough
CT: control target
= control target key end

     0   :  { %s296_s1 = inlined_call_operand.vmem [shape: bf16[128,128], index: 1, kind: input, shape index: {}]   ;;  %s297_s0 = inlined_call_operand.vmem [shape: f32[32,128], index: 0, kind: input, shape index: {}]   ;;  %s298_s2 = inlined_call_operand.vmem [shape: f32[1,128], index: 2, kind: input, shape index: {}]   ;;  %s299_s3 = inlined_call_operand.vmem [shape: bf16[32,128], index: 3, kind: output, shape index: {}]  }
   0x1   :  { %v223_v0 = vld [vmem:[%s296_s1 + $0x38] sm:$0xff]   ;;  %v224_v1 = vld [vmem:[%s296_s1 + $0x30] sm:$0xff]   ;;  %v225_v2 = vld [vmem:[%s296_s1 + $0x28] sm:$0xff]  }
   0x2   :  { %203 = vmatprep.subr.bf16.mxu0 %v223_v0  ;;  %v15_v3 = vld [vmem:[%s297_s0] sm:$0xff]  ;;  %v16_v4 = vld [vmem:[%s297_s0 + $0x8] sm:$0xff]  ;;  %v227_v7 = vld [vmem:[%s296_s1 + $0x18] sm:$0xff]  }
   0x3   :  { %204 = vmatpush3.bf16.xpose.msra.mxu0 %v223_v0  ;;  %v19_v5 = vpack.c.bf16 %v16_v4, %v15_v3  ;;  %v226_v6 = vld [vmem:[%s296_s1 + $0x20] sm:$0xff]   ;;  %v228_v8 = vld [vmem:[%s296_s1 + $0x10] sm:$0xff]   ;;  %v229_v9 = vld [vmem:[%s296_s1 + $0x8] sm:$0xff]  }
   0x4   :  { %205 = vmatprep.subr.bf16.mxu0 %v224_v1  ;;  %v230_v10 = vld [vmem:[%s296_s1] sm:$0xff]   ;;  %v17_v11 = vld [vmem:[%s297_s0 + $0x10] sm:$0xff]  ;;  %v18_v12 = vld [vmem:[%s297_s0 + $0x18] sm:$0xff] }
   0x5   :  { %219 = vmatprep.mubr.bf16.mxu0 %v19_v5  ;;  %v20_v13 = vpack.c.bf16 %v18_v12, %v17_v11  ;;  %v165_v15 = vld [vmem:[%s298_s2] ss:$0 sm:$0xff] }
   0xb   :  { %206 = vmatpush3.bf16.xpose.msra.mxu0 %v224_v1 }
   0xc   :  { %207 = vmatprep.subr.bf16.mxu0 %v225_v2 }
  0x13   :  { %208 = vmatpush3.bf16.xpose.msra.mxu0 %v225_v2 }
  0x14   :  { %209 = vmatprep.subr.bf16.mxu0 %v226_v6 }
  0x1b   :  { %210 = vmatpush3.bf16.xpose.msra.mxu0 %v226_v6 }
  0x1c   :  { %211 = vmatprep.subr.bf16.mxu0 %v227_v7 }
  0x23   :  { %212 = vmatpush3.bf16.xpose.msra.mxu0 %v227_v7 }
  0x24   :  { %213 = vmatprep.subr.bf16.mxu0 %v228_v8 }
  0x2b   :  { %214 = vmatpush3.bf16.xpose.msra.mxu0 %v228_v8 }
  0x2c   :  { %215 = vmatprep.subr.bf16.mxu0 %v229_v9 }
  0x33   :  { %216 = vmatpush3.bf16.xpose.msra.mxu0 %v229_v9 }
  0x34   :  { %217 = vmatprep.subr.bf16.mxu0 %v230_v10 }
  0x3b   :  { %218 = vmatpush3.bf16.xpose.msra.mxu0 %v230_v10 }
  0x42   :  { %220 = vmatmul.mubr.bf16.vlgmr.msra.gmra.mxu0 %v20_v13 }
 0x102   :  { %v221_v14 = vpop.f32.mrf.mxu0 }
 0x103   :  { %v135_v18 = vadd.f32 %v221_v14, %v165_v15 }
 0x104   :  { %v126_v16 = vpop.f32.mrf.mxu0 }
 0x105   :  { %v127_v21 = vadd.f32 %v165_v15, %v126_v16 }
 0x106   :  { %v222_v17 = vpop.f32.mrf.mxu0 }
 0x107   :  { %v138_v19 = vadd.f32 %v222_v17, %v165_v15 }
 0x108   :  { %v129_v20 = vpop.f32.mrf.mxu0 }
 0x109   :  { %v190_v22 = vpack.c.bf16 %v138_v19, %v135_v18  ;;  %v130_v23 = vadd.f32 %v165_v15, %v129_v20 }
 0x10b   :  { %192 = vst [vmem:[%s299_s3 + $0x8] sm:$0xff] %v190_v22   ;;  %v185_v24 = vpack.c.bf16 %v130_v23, %v127_v21 }
 0x10d   :  { %186 = vst [vmem:[%s299_s3] sm:$0xff] %v185_v24  }

// kernel: _decoder_core.16
= control target key start
LH: loop header
LB: loop body
LE: loop exit
PB: predicated region body
PF: predicated region fallthrough
CT: control target
= control target key end

     0   :  { %v74_v30 = vlaneseq  ;;  %s697_s1 = inlined_call_operand.vmem [shape: bf16[384,128], index: 1, kind: input, shape index: {}]   ;;  %s698_s0 = inlined_call_operand.vmem [shape: f32[32,128], index: 0, kind: input, shape index: {}]   ;;  %s699_s2 = inlined_call_operand.vmem [shape: f32[1,384], index: 2, kind: input, shape index: {}]   ;;  %s700_s3 = inlined_call_operand.vmem [shape: bf16[32,128], index: 3, kind: output, shape index: {0}]   ;;  %s701_s4 = inlined_call_operand.vmem [shape: bf16[32,128], index: 4, kind: output, shape index: {1}]   ;;  %s702_s5 = inlined_call_operand.vmem [shape: bf16[32,128], index: 5, kind: output, shape index: {2}]  }
   0x1   :  { %v538_v0 = vld [vmem:[%s697_s1 + $0x78] sm:$0xff]   ;;  %v541_v3 = vld [vmem:[%s697_s1 + $0x70] sm:$0xff]   ;;  %v544_v6 = vld [vmem:[%s697_s1 + $0x68] sm:$0xff]  }
   0x2   :  { %v539_v1 = vld [vmem:[%s697_s1 + $0x38] sm:$0xff]   ;;  %488 = vmatprep.subr.bf16.mxu0 %v538_v0  ;;  %v543_v4 = vld [vmem:[%s697_s1 + $0xb0] sm:$0xff]   ;;  %v546_v7 = vld [vmem:[%s697_s1 + $0xa8] sm:$0xff]   ;;  %v75_v31 = vshrl.u32 %v74_v30, 7 }
   0x3   :  { %v540_v2 = vld [vmem:[%s697_s1 + $0xb8] sm:$0xff]   ;;  %489 = vmatpush3.bf16.xpose.msra.mxu0 %v539_v1  ;;  %v542_v5 = vld [vmem:[%s697_s1 + $0x30] sm:$0xff]   ;;  %v545_v8 = vld [vmem:[%s697_s1 + $0x28] sm:$0xff]  }
   0x4   :  { %518 = vmatprep.subr.bf16.mxu1 %v540_v2  ;;  %490 = vmatprep.subr.bf16.mxu0 %v541_v3  ;;  %v547_v9 = vld [vmem:[%s697_s1 + $0x60] sm:$0xff]   ;;  %v550_v12 = vld [vmem:[%s697_s1 + $0x58] sm:$0xff]   ;;  %v19_v14 = vld [vmem:[%s698_s0 + $0x8] sm:$0xff]  ;;  %v76_v32 = vsub.s32 0, %v75_v31  ;;  %v84_v33 = vsub.s32 2, %v75_v31  ;;  %v80_v35 = vsub.s32 1, %v75_v31 }
   0x5   :  { %519 = vmatpush3.bf16.xpose.msra.mxu1 %v540_v2  ;;  %v549_v10 = vld [vmem:[%s697_s1 + $0xa0] sm:$0xff]   ;;  %v552_v16 = vld [vmem:[%s697_s1 + $0x98] sm:$0xff]   ;;  %v553_v18 = vld [vmem:[%s697_s1 + $0x50] sm:$0xff]  }
   0x6   :  { %520 = vmatprep.subr.bf16.mxu1 %v543_v4  ;;  %v548_v11 = vld [vmem:[%s697_s1 + $0x20] sm:$0xff]   ;;  %v551_v17 = vld [vmem:[%s697_s1 + $0x18] sm:$0xff]   ;;  %v555_v19 = vld [vmem:[%s697_s1 + $0x90] sm:$0xff]  }
   0x7   :  { %v18_v13 = vld [vmem:[%s698_s0] sm:$0xff]  ;;  %v554_v20 = vld [vmem:[%s697_s1 + $0x10] sm:$0xff]   ;;  %v556_v21 = vld [vmem:[%s697_s1 + $0x48] sm:$0xff]  }
   0x8   :  { %v22_v15 = vpack.c.bf16 %v19_v14, %v18_v13  ;;  %v558_v22 = vld [vmem:[%s697_s1 + $0x88] sm:$0xff]   ;;  %v559_v24 = vld [vmem:[%s697_s1 + $0x40] sm:$0xff]   ;;  %v20_v27 = vld [vmem:[%s698_s0 + $0x10] sm:$0xff] }
   0x9   :  { %v557_v23 = vld [vmem:[%s697_s1 + $0x8] sm:$0xff]   ;;  %v561_v25 = vld [vmem:[%s697_s1 + $0x80] sm:$0xff]   ;;  %v21_v28 = vld [vmem:[%s698_s0 + $0x18] sm:$0xff] }
   0xa   :  { %504 = vmatprep.mubr.bf16.mxu0 %v22_v15  ;;  %534 = vmatprep.mubr.bf16.mxu1 %v22_v15  ;;  %v560_v26 = vld [vmem:[%s697_s1] sm:$0xff]   ;;  %v23_v29 = vpack.c.bf16 %v21_v28, %v20_v27 }
   0xb   :  { %491 = vmatpush3.bf16.xpose.msra.mxu0 %v542_v5  ;;  %v72_v34 = vld [vmem:[%s699_s2] sm:$0x7] }
   0xc   :  { %492 = vmatprep.subr.bf16.mxu0 %v544_v6  ;;  %v77_v37 = vrot.slane %v72_v34, %v76_v32  ;;  %v85_v38 = vrot.slane %v72_v34, %v84_v33  ;;  %v81_v39 = vrot.slane %v72_v34, %v80_v35 }
   0xd   :  { %521 = vmatpush3.bf16.xpose.msra.mxu1 %v543_v4 }
   0xe   :  { %522 = vmatprep.subr.bf16.mxu1 %v546_v7 }
  0x13   :  { %493 = vmatpush3.bf16.xpose.msra.mxu0 %v545_v8 }
  0x14   :  { %494 = vmatprep.subr.bf16.mxu0 %v547_v9 }
  0x15   :  { %523 = vmatpush3.bf16.xpose.msra.mxu1 %v546_v7 }
  0x16   :  { %524 = vmatprep.subr.bf16.mxu1 %v549_v10 }
  0x1b   :  { %495 = vmatpush3.bf16.xpose.msra.mxu0 %v548_v11 }
  0x1c   :  { %496 = vmatprep.subr.bf16.mxu0 %v550_v12 }
  0x1d   :  { %525 = vmatpush3.bf16.xpose.msra.mxu1 %v549_v10 }
  0x1e   :  { %526 = vmatprep.subr.bf16.mxu1 %v552_v16 }
  0x23   :  { %497 = vmatpush3.bf16.xpose.msra.mxu0 %v551_v17 }
  0x24   :  { %498 = vmatprep.subr.bf16.mxu0 %v553_v18 }
  0x25   :  { %527 = vmatpush3.bf16.xpose.msra.mxu1 %v552_v16 }
  0x26   :  { %528 = vmatprep.subr.bf16.mxu1 %v555_v19 }
  0x2b   :  { %499 = vmatpush3.bf16.xpose.msra.mxu0 %v554_v20 }
  0x2c   :  { %500 = vmatprep.subr.bf16.mxu0 %v556_v21 }
  0x2d   :  { %529 = vmatpush3.bf16.xpose.msra.mxu1 %v555_v19 }
  0x2e   :  { %530 = vmatprep.subr.bf16.mxu1 %v558_v22 }
  0x33   :  { %501 = vmatpush3.bf16.xpose.msra.mxu0 %v557_v23 }
  0x34   :  { %502 = vmatprep.subr.bf16.mxu0 %v559_v24 }
  0x35   :  { %531 = vmatpush3.bf16.xpose.msra.mxu1 %v558_v22 }
  0x36   :  { %532 = vmatprep.subr.bf16.mxu1 %v561_v25 }
  0x3b   :  { %503 = vmatpush3.bf16.xpose.msra.mxu0 %v560_v26 }
  0x3d   :  { %533 = vmatpush3.bf16.xpose.msra.mxu1 %v561_v25 }
  0x42   :  { %505 = vmatmul.mubr.bf16.vlgmr.msra.gmra.mxu0 %v22_v15 }
  0x43   :  { %506 = vmatprep.mubr.bf16.mxu0 %v23_v29 }
  0x44   :  { %535 = vmatmul.mubr.bf16.vlgmr.msra.gmra.mxu1 %v23_v29 }
  0x4a   :  { %507 = vmatmul.mubr.bf16.gmra.mxu0 %v23_v29 }
 0x102   :  { %v267_v36 = vpop.f32.mrf.mxu0 }
 0x103   :  { %v268_v44 = vadd.f32 %v267_v36, %v77_v37 }
 0x104   :  { %v269_v40 = vpop.f32.mrf.mxu0  ;;  %v536_v41 = vpop.f32.mrf.mxu1 }
 0x105   :  { %v329_v45 = vadd.f32 %v536_v41, %v85_v38  ;;  %v270_v47 = vadd.f32 %v269_v40, %v81_v39 }
 0x106   :  { %v271_v42 = vpop.f32.mrf.mxu0  ;;  %v320_v43 = vpop.f32.mrf.mxu1 }
 0x107   :  { %v272_v46 = vadd.f32 %v271_v42, %v77_v37  ;;  %v321_v51 = vadd.f32 %v320_v43, %v85_v38 }
 0x108   :  { %v273_v48 = vpop.f32.mrf.mxu0  ;;  %v537_v49 = vpop.f32.mrf.mxu1 }
 0x109   :  { %v458_v50 = vpack.c.bf16 %v272_v46, %v268_v44  ;;  %v274_v52 = vadd.f32 %v273_v48, %v81_v39  ;;  %v332_v53 = vadd.f32 %v537_v49, %v85_v38 }
 0x10a   :  { %v277_v54 = vpop.f32.mrf.mxu0  ;;  %v323_v55 = vpop.f32.mrf.mxu1 }
 0x10b   :  { %459 = vst [vmem:[%s700_s3] sm:$0xff] %v458_v50   ;;  %v468_v56 = vpack.c.bf16 %v274_v52, %v270_v47  ;;  %v483_v57 = vpack.c.bf16 %v332_v53, %v329_v45  ;;  %v324_v58 = vadd.f32 %v323_v55, %v85_v38  ;;  %v278_v62 = vadd.f32 %v277_v54, %v77_v37 }
 0x10c   :  { %v279_v59 = vpop.f32.mrf.mxu0 }
 0x10d   :  { %469 = vst [vmem:[%s701_s4] sm:$0xff] %v468_v56   ;;  %487 = vst [vmem:[%s702_s5 + $0x8] sm:$0xff] %v483_v57   ;;  %v478_v60 = vpack.c.bf16 %v324_v58, %v321_v51  ;;  %v280_v1 = vadd.f32 %v279_v59, %v81_v39 }
 0x10e   :  { %v281_v61 = vpop.f32.mrf.mxu0 }
 0x10f   :  { %479 = vst [vmem:[%s702_s5] sm:$0xff] %v478_v60   ;;  %v282_v63 = vadd.f32 %v281_v61, %v77_v37 }
 0x110   :  { %v283_v0 = vpop.f32.mrf.mxu0 }
 0x111   :  { %v463_v2 = vpack.c.bf16 %v282_v63, %v278_v62  ;;  %v284_v3 = vadd.f32 %v283_v0, %v81_v39 }
 0x113   :  { %485 = vst [vmem:[%s700_s3 + $0x8] sm:$0xff] %v463_v2   ;;  %v473_v4 = vpack.c.bf16 %v284_v3, %v280_v1 }
 0x115   :  { %486 = vst [vmem:[%s701_s4 + $0x8] sm:$0xff] %v473_v4  }

// kernel: _decoder_core.17
= control target key start
LH: loop header
LB: loop body
LE: loop exit
PB: predicated region body
PF: predicated region fallthrough
CT: control target
= control target key end

     0   :  { %s1019_s15 = smov 0   ;;  %s1021_s16 = smov 0   ;;  %s1148_s0 = inlined_call_operand.vmem [shape: bf16[2,2,16,64], index: 0, kind: input, shape index: {}]   ;;  %s1149_s1 = inlined_call_operand.vmem [shape: bf16[2,2,16,64], index: 1, kind: input, shape index: {}]   ;;  %s1150_s2 = inlined_call_operand.vmem [shape: bf16[2,2,16,64], index: 2, kind: input, shape index: {}]   ;;  %s1151_s3 = inlined_call_operand.vmem [shape: bf16[128,64], index: 3, kind: input, shape index: {}]   ;;  %s1152_s4 = inlined_call_operand.vmem [shape: bf16[2,2,16,64], index: 4, kind: output, shape index: {}]  }
   0x1   :  { %s1023_s17 = smov 0   ;;  %s1025_s18 = smov 0  }
   0x2   :  { %s1027_s19 = smov 0  }
   0x3 LB: > { %s29_s20 = sadd.s32 1, %s979_s17  ;;  %s33_s21 = sadd.s32 1, %s983_s18  ;;  %s987_s19 = sphi %s1027_s19, %s14_s19   ;;  %s983_s18 = sphi %s1025_s18, %s1156_s18   ;;  %s979_s17 = sphi %s1023_s17, %s1155_s17   ;;  %s975_s16 = sphi %s1021_s16, %s1154_s16   ;;  %s971_s15 = sphi %s1019_s15, %s1153_s15  }
   0x4   : > { %p31_p0 = scmp.ge.s32.totalorder %s29_s20, 2  ;;  %p807_p1 = scmp.ge.s32.totalorder %s987_s19, 1 }
   0x5   : > { %p230_p2 = scmp.lt.s32.totalorder %s987_s19, 5 }
   0x6   : > { %s1158_s20 = smov (%p31_p0, %s29_s20), 0  ;;  %s1160_s21 = smov (!%p31_p0, %s33_s21), %s983_s18 }
   0x7   : > { %p231_p3 = pnand %p807_p1, %p230_p2  ;;  %p35_p4 = scmp.ge.s32.totalorder %s1160_s21, 2 }
   0x8   : > { %p291_p5 = scmp.lt.s32.totalorder (!%p231_p3), %s975_s16, 1  ;;  %p293_p6 = scmp.lt.s32.totalorder (!%p231_p3), %s971_s15, 1 }
   0x9   : > { %s1162_s21 = smov (%p35_p4, %s1160_s21), 0  ;;  %234 = sbr.rel (%p231_p3) target bundleno = 1025 (0x401), region = 36 }
   0xa   : > { %s991_s27 = smov (!%p231_p3), 256  }
   0xe   : > { %v930_v0 = vld [vmem:[%s1151_s3 + $0x38] sm:$0xff]   ;;  %v989_v1 = vmov 0.0   ;;  %vm405_vm0 = vcmask 523264   ;;  %v931_v3 = vld [vmem:[%s1151_s3 + $0x30] sm:$0xff]   ;;  %vm990_vm1 = vmmov 0   ;;  %s1164_s16 = smov (!%p291_p5, %s975_s16), 1  ;;  %v494_v30 = vlaneseq }
   0xf   : > { %853 = vmatprep.subr.bf16.mxu0 %v989_v1  ;;  %873 = vmatprep.subr.bf16.mxu1 %v989_v1  ;;  %v431_v2 = vsel %vm405_vm0, %v930_v0, 0  ;;  %v428_v4 = vsel %vm405_vm0, %v931_v3, 0  ;;  %s1166_s15 = smov (!%p293_p6, %s971_s15), 1  ;;  %v932_v5 = vld [vmem:[%s1151_s3 + $0x28] sm:$0xff]   ;;  %s809_s28 = sshll.u32 %s1164_s16, 2  ;;  %v933_v7 = vld [vmem:[%s1151_s3 + $0x20] sm:$0xff]  }
  0x10   : > { %854 = vmatpush3.bf16.xpose.msra.mxu0 %v431_v2  ;;  %869 = vmatprep.mubr.msk.bf16.mxu0 %vm990_vm1, %v989_v1  ;;  %s808_s29 = sshll.u32 %s1166_s15, 1  ;;  %v425_v6 = vsel %vm405_vm0, %v932_v5, 0  ;;  %v422_v8 = vsel %vm405_vm0, %v933_v7, 0  ;;  %v934_v9 = vld [vmem:[%s1151_s3 + $0x18] sm:$0xff]   ;;  %v935_v11 = vld [vmem:[%s1151_s3 + $0x10] sm:$0xff]   ;;  %v936_v13 = vld [vmem:[%s1151_s3 + $0x8] sm:$0xff]  }
  0x11   : > { %855 = vmatprep.subr.bf16.mxu0 %v989_v1  ;;  %875 = vmatprep.mubr.msk.bf16.mxu1 %vm990_vm1, %v989_v1  ;;  %s300_s30 = sadd.s32 %s809_s28, %s808_s29  ;;  %v419_v10 = vsel %vm405_vm0, %v934_v9, 0  ;;  %v416_v12 = vsel %vm405_vm0, %v935_v11, 0  ;;  %v413_v14 = vsel %vm405_vm0, %v936_v13, 0  ;;  %v937_v15 = vld [vmem:[%s1151_s3] sm:$0xff]   ;;  %s992_s28 = smov 264   ;;  %v495_v31 = vshrl.u32 %v494_v30, 7 }
  0x12   : > { %s1076_s5 = sshll.u32 %s300_s30, 2  ;;  %v410_v16 = vsel %vm405_vm0, %v937_v15, 0  ;;  %s993_s29 = smov 113   ;;  %v501_v32 = vand.u32 127, %v494_v30  ;;  %vm561_vm6 = vcmask 130048   ;;  %vm643_vm7 = vcmask 519168  }
  0x13   : > { %s302_s8 = scalar_lea.vmem %s1148_s0, %s1076_s5  ;;  %s312_s26 = scalar_lea.vmem %s1149_s1, %s1076_s5  ;;  %v496_v33 = vadd.s32 8, %v495_v31 }
  0x14   : > { %v938_v17 = vld [vmem:[%s302_s8] sm:$0xff]   ;;  %vm502_vm2 = vcmp.le.s32.totalorder %v501_v32, %v495_v31  ;;  %vm555_vm3 = vcmp.gt.s32.totalorder %v501_v32, %v495_v31  ;;  %s321_s7 = scalar_lea.vmem %s1150_s2, %s1076_s5  ;;  %s334_s10 = scalar_lea.vmem %s1152_s4, %s1076_s5 }
  0x15   : > { %v939_v18 = vld [vmem:[%s312_s26] sm:$0xff]   ;;  %v557_v36 = vsel %vm555_vm3, -1e+09, %v989_v1  ;;  %vm503_vm4 = vcmp.le.s32.totalorder %v501_v32, %v496_v33  ;;  %vm556_vm5 = vcmp.gt.s32.totalorder %v501_v32, %v496_v33 }
  0x16   : > { %v512_v19 = vsel %vm405_vm0, %v939_v18, 0  ;;  %v558_v41 = vsel %vm556_vm5, -1e+09, %v989_v1  ;;  %v940_v56 = vld [vmem:[%s321_s7] sm:$0xff]  }
  0x17   : > { %874 = vmatpush3.bf16.xpose.msra.mxu1 %v512_v19 }
  0x18   : > { %856 = vmatpush3.bf16.xpose.msra.mxu0 %v428_v4  ;;  %879 = vmatprep.subr.bf16.mxu1 %v989_v1 }
  0x19   : > { %857 = vmatprep.subr.bf16.mxu0 %v989_v1 }
  0x1e   : > { %876 = vmatmul.mubr.msk.bf16.vlgmr.msra.gmra.mxu1 %vm405_vm0, %v938_v17 }
  0x1f   : > { %881 = vmatprep.mubr.msk.bf16.mxu1 %vm990_vm1, %v989_v1  ;;  %880 = vmatpush3.bf16.msra.mxu1 %v940_v56 }
  0x20   : > { %858 = vmatpush3.bf16.xpose.msra.mxu0 %v425_v6 }
  0x21   : > { %859 = vmatprep.subr.bf16.mxu0 %v989_v1 }
  0x28   : > { %860 = vmatpush3.bf16.xpose.msra.mxu0 %v422_v8 }
  0x29   : > { %861 = vmatprep.subr.bf16.mxu0 %v989_v1 }
  0x30   : > { %862 = vmatpush3.bf16.xpose.msra.mxu0 %v419_v10 }
  0x31   : > { %863 = vmatprep.subr.bf16.mxu0 %v989_v1 }
  0x38   : > { %864 = vmatpush3.bf16.xpose.msra.mxu0 %v416_v12 }
  0x39   : > { %865 = vmatprep.subr.bf16.mxu0 %v989_v1 }
  0x40   : > { %866 = vmatpush3.bf16.xpose.msra.mxu0 %v413_v14 }
  0x41   : > { %867 = vmatprep.subr.bf16.mxu0 %v989_v1 }
  0x48   : > { %868 = vmatpush3.bf16.xpose.msra.mxu0 %v410_v16 }
  0x4f   : > { %870 = vmatmul.mubr.msk.bf16.vlgmr.msra.gmra.mxu0 %vm405_vm0, %v938_v17 }
  0xde   : > { %v548_v24 = vpop.f32.mrf.mxu1 }
  0xe0   : > { %v877_v25 = vpop.f32.mrf.mxu1 }
  0xe2   : > { %v551_v26 = vpop.f32.mrf.mxu1 }
  0xe4   : > { %v878_v27 = vpop.f32.mrf.mxu1 }
 0x10f   : > { %v467_v20 = vpop.f32.mrf.mxu0 }
 0x110   : > { %480 = vrot.lane.b32.xlu0 %v467_v20, %s991_s27 }
 0x111   : > { %v871_v21 = vpop.f32.mrf.mxu0 }
 0x113   : > { %v470_v22 = vpop.f32.mrf.mxu0 }
 0x114   : > { %488 = vrot.lane.b32.xlu0 %v470_v22, %s992_s28 }
 0x115   : > { %v872_v23 = vpop.f32.mrf.mxu0 }
 0x182   : > { %v481_v28 = vpop.permute.xlu0 %480 }
 0x183   : > { %490 = vrot.lane.b32.xlu1 %v481_v28, %s993_s29 }
 0x186   : > { %v489_v29 = vpop.permute.xlu0 %488 }
 0x187   : > { %492 = vrot.lane.b32.xlu1 %v489_v29, %s993_s29 }
 0x1f5   : > { %v491_v34 = vpop.permute.xlu1 %490 }
 0x1f6   : > { %v504_v35 = vsel %vm502_vm2, %v491_v34, 0.0 }
 0x1f7   : > { %v549_v37 = vadd.f32 %v548_v24, %v504_v35 }
 0x1f9   : > { %v493_v38 = vpop.permute.xlu1 %492  ;;  %v559_v39 = vadd.f32 %v557_v36, %v549_v37 }
 0x1fa   : > { %v505_v40 = vsel %vm503_vm4, %v493_v38, 0.0 }
 0x1fb   : > { %v552_v42 = vadd.f32 %v551_v26, %v505_v40  ;;  %v562_v43 = vsel %vm561_vm6, %v559_v39, -inf }
 0x1fc   : > { %563 = vmax.xlane.f32.xlu0 %v562_v43 }
 0x1fd   : > { %v560_v44 = vadd.f32 %v558_v41, %v552_v42 }
 0x1ff   : > { %v565_v45 = vsel %vm561_vm6, %v560_v44, -inf }
 0x200   : > { %566 = vmax.xlane.f32.xlu1 %v565_v45 }
 0x285   : > { %v564_v46 = vpop.xlane.xlu0 %563 }
 0x286   : > { %v568_v47 = vsub.f32 %v559_v39, %v564_v46 }
 0x288   : > { %v570_v48 = vmul.f32 1.442695, %v568_v47 }
 0x289   : > { %v567_v49 = vpop.xlane.xlu1 %566 }
 0x28a   : > { %941 = vpow2.f32 %v570_v48  ;;  %v569_v50 = vsub.f32 %v560_v44, %v567_v49 }
 0x28c   : > { %v572_v51 = vmul.f32 1.442695, %v569_v50 }
 0x28e   : > { %943 = vpow2.f32 %v572_v51 }
 0x297   : > { %v942_v52 = vpop.eup %941 }
 0x298   : > { %v574_v53 = vsel %vm561_vm6, %v942_v52, 0.0 }
 0x299   : > { %575 = vadd.xlane.f32.xlu0 %v574_v53 }
 0x29b   : > { %v944_v54 = vpop.eup %943 }
 0x29c   : > { %v577_v55 = vsel %vm561_vm6, %v944_v54, 0.0 }
 0x29d   : > { %578 = vadd.xlane.f32.xlu0 %v577_v55 }
 0x322   : > { %v576_v57 = vpop.xlane.xlu0 %575 }
 0x323   : > { %945 = vrcp.f32 %v576_v57 }
 0x326   : > { %v579_v58 = vpop.xlane.xlu0 %578 }
 0x327   : > { %947 = vrcp.f32 %v579_v58 }
 0x330   : > { %v946_v59 = vpop.eup %945 }
 0x331   : > { %v582_v62 = vmul.f32 %v946_v59, %v942_v52 }
 0x334   : > { %v948_v60 = vpop.eup %947 }
 0x335   : > { %v583_v61 = vmul.f32 %v948_v60, %v944_v54 }
 0x337   : > { %v584_v63 = vpack.c.bf16 %v583_v61, %v582_v62 }
 0x339   : > { %882 = vmatmul.mubr.msk.bf16.vlgmr.msra.gmra.mxu1 %vm561_vm6, %v584_v63 }
 0x3f9   : > { %v628_v0 = vpop.f32.mrf.mxu1 }
 0x3fa   : > { %v838_v1 = vpack.c.bf16 %v628_v0, %v628_v0 }
 0x3fb   : > { %v883_v2 = vpop.f32.mrf.mxu1 }
 0x3fc   : > { %644 = vst.msk [vmem:[%s334_s10] sm:$0xf] %vm643_vm7, %v838_v1 }
 0x3fd   : > { %v631_v3 = vpop.f32.mrf.mxu1 }
 0x3fe   : > { %v839_v4 = vpack.c.bf16 %v631_v3, %v631_v3 }
 0x3ff   : > { %v884_v5 = vpop.f32.mrf.mxu1 }
 0x400   : > { %645 = vst.msk [vmem:[%s334_s10 + $0x4] sm:$0xf] %vm643_vm7, %v839_v4 }
 0x401 PF: > { %s14_s19 = sadd.s32 1, %s987_s19   ;;  %s1153_s15 = smov %s979_s17 }
 0x402   : > { %p11_p7 = scmp.ge.s32.totalorder %s14_s19, 6   ;;  %s1154_s16 = smov %s983_s18 }
 0x403   : > { %s1155_s17 = smov %s1158_s20  ;;  %s1156_s18 = smov %s1162_s21 }
 0x404   :  { %13 = sbr.rel (!%p11_p7) target bundleno = 3 (0x3), region = 72 }

// kernel: _decoder_core.20
= control target key start
LH: loop header
LB: loop body
LE: loop exit
PB: predicated region body
PF: predicated region fallthrough
CT: control target
= control target key end

     0   :  { %v57_v22 = vlaneseq  ;;  %s470_s1 = inlined_call_operand.vmem [shape: bf16[256,128], index: 1, kind: input, shape index: {}]   ;;  %s471_s0 = inlined_call_operand.vmem [shape: f32[32,128], index: 0, kind: input, shape index: {}]   ;;  %s472_s2 = inlined_call_operand.vmem [shape: f32[1,256], index: 2, kind: input, shape index: {}]   ;;  %s473_s3 = inlined_call_operand.vmem [shape: bf16[32,128], index: 3, kind: output, shape index: {0}]   ;;  %s474_s4 = inlined_call_operand.vmem [shape: bf16[32,128], index: 4, kind: output, shape index: {1}]  }
   0x1   :  { %v354_v0 = vld [vmem:[%s470_s1 + $0x78] sm:$0xff]   ;;  %v356_v2 = vld [vmem:[%s470_s1 + $0x70] sm:$0xff]   ;;  %v358_v4 = vld [vmem:[%s470_s1 + $0x68] sm:$0xff]  }
   0x2   :  { %v355_v1 = vld [vmem:[%s470_s1 + $0x38] sm:$0xff]   ;;  %318 = vmatprep.subr.bf16.mxu0 %v354_v0  ;;  %338 = vmatprep.subr.bf16.mxu1 %v354_v0  ;;  %v357_v3 = vld [vmem:[%s470_s1 + $0x30] sm:$0xff]   ;;  %v359_v5 = vld [vmem:[%s470_s1 + $0x28] sm:$0xff]   ;;  %v58_v23 = vshrl.u32 %v57_v22, 7 }
   0x3   :  { %319 = vmatpush3.bf16.xpose.msra.mxu0 %v355_v1  ;;  %346 = vmatpush3.bf16.xpose.msra.mxu1 %v355_v1  ;;  %v360_v6 = vld [vmem:[%s470_s1 + $0x60] sm:$0xff]   ;;  %v18_v8 = vld [vmem:[%s471_s0 + $0x8] sm:$0xff]  ;;  %v19_v9 = vld [vmem:[%s471_s0 + $0x10] sm:$0xff] }
   0x4   :  { %320 = vmatprep.subr.bf16.mxu0 %v356_v2  ;;  %339 = vmatprep.subr.bf16.mxu1 %v356_v2  ;;  %v17_v7 = vld [vmem:[%s471_s0] sm:$0xff]  ;;  %v20_v11 = vld [vmem:[%s471_s0 + $0x18] sm:$0xff]  ;;  %v364_v16 = vld [vmem:[%s470_s1 + $0x50] sm:$0xff]   ;;  %v59_v24 = vsub.s32 0, %v58_v23  ;;  %v63_v26 = vsub.s32 1, %v58_v23 }
   0x5   :  { %v21_v10 = vpack.c.bf16 %v18_v8, %v17_v7  ;;  %v22_v12 = vpack.c.bf16 %v20_v11, %v19_v9  ;;  %v361_v13 = vld [vmem:[%s470_s1 + $0x20] sm:$0xff]   ;;  %v362_v14 = vld [vmem:[%s470_s1 + $0x58] sm:$0xff]   ;;  %v365_v17 = vld [vmem:[%s470_s1 + $0x10] sm:$0xff]  }
   0x6   :  { %v363_v15 = vld [vmem:[%s470_s1 + $0x18] sm:$0xff]   ;;  %v366_v18 = vld [vmem:[%s470_s1 + $0x48] sm:$0xff]   ;;  %v368_v20 = vld [vmem:[%s470_s1 + $0x40] sm:$0xff]  }
   0x7   :  { %334 = vmatprep.mubr.bf16.mxu0 %v21_v10  ;;  %336 = vmatprep.mubr.bf16.mxu1 %v22_v12  ;;  %v367_v19 = vld [vmem:[%s470_s1 + $0x8] sm:$0xff]   ;;  %v369_v21 = vld [vmem:[%s470_s1] sm:$0xff]  }
   0x8   :  { %v55_v25 = vld [vmem:[%s472_s2] sm:$0x3] }
   0x9   :  { %v60_v29 = vrot.slane %v55_v25, %v59_v24  ;;  %v64_v30 = vrot.slane %v55_v25, %v63_v26 }
   0xb   :  { %321 = vmatpush3.bf16.xpose.msra.mxu0 %v357_v3  ;;  %347 = vmatpush3.bf16.xpose.msra.mxu1 %v357_v3 }
   0xc   :  { %322 = vmatprep.subr.bf16.mxu0 %v358_v4  ;;  %340 = vmatprep.subr.bf16.mxu1 %v358_v4 }
  0x13   :  { %323 = vmatpush3.bf16.xpose.msra.mxu0 %v359_v5  ;;  %348 = vmatpush3.bf16.xpose.msra.mxu1 %v359_v5 }
  0x14   :  { %324 = vmatprep.subr.bf16.mxu0 %v360_v6  ;;  %341 = vmatprep.subr.bf16.mxu1 %v360_v6 }
  0x1b   :  { %325 = vmatpush3.bf16.xpose.msra.mxu0 %v361_v13  ;;  %349 = vmatpush3.bf16.xpose.msra.mxu1 %v361_v13 }
  0x1c   :  { %326 = vmatprep.subr.bf16.mxu0 %v362_v14  ;;  %342 = vmatprep.subr.bf16.mxu1 %v362_v14 }
  0x23   :  { %327 = vmatpush3.bf16.xpose.msra.mxu0 %v363_v15  ;;  %350 = vmatpush3.bf16.xpose.msra.mxu1 %v363_v15 }
  0x24   :  { %328 = vmatprep.subr.bf16.mxu0 %v364_v16  ;;  %343 = vmatprep.subr.bf16.mxu1 %v364_v16 }
  0x2b   :  { %329 = vmatpush3.bf16.xpose.msra.mxu0 %v365_v17  ;;  %351 = vmatpush3.bf16.xpose.msra.mxu1 %v365_v17 }
  0x2c   :  { %330 = vmatprep.subr.bf16.mxu0 %v366_v18  ;;  %344 = vmatprep.subr.bf16.mxu1 %v366_v18 }
  0x33   :  { %331 = vmatpush3.bf16.xpose.msra.mxu0 %v367_v19  ;;  %352 = vmatpush3.bf16.xpose.msra.mxu1 %v367_v19 }
  0x34   :  { %332 = vmatprep.subr.bf16.mxu0 %v368_v20  ;;  %345 = vmatprep.subr.bf16.mxu1 %v368_v20 }
  0x3b   :  { %333 = vmatpush3.bf16.xpose.msra.mxu0 %v369_v21  ;;  %353 = vmatpush3.bf16.xpose.msra.mxu1 %v369_v21 }
  0x42   :  { %335 = vmatmul.mubr.bf16.vlgmr.msra.gmra.mxu0 %v21_v10  ;;  %337 = vmatmul.mubr.bf16.vlgmr.msra.gmra.mxu1 %v22_v12 }
 0x102   :  { %v197_v27 = vpop.f32.mrf.mxu0  ;;  %v207_v28 = vpop.f32.mrf.mxu1 }
 0x103   :  { %v198_v35 = vadd.f32 %v197_v27, %v60_v29  ;;  %v208_v36 = vadd.f32 %v207_v28, %v60_v29 }
 0x104   :  { %v199_v31 = vpop.f32.mrf.mxu0  ;;  %v209_v32 = vpop.f32.mrf.mxu1 }
 0x105   :  { %v200_v39 = vadd.f32 %v199_v31, %v64_v30  ;;  %v210_v40 = vadd.f32 %v209_v32, %v64_v30 }
 0x106   :  { %v201_v33 = vpop.f32.mrf.mxu0  ;;  %v211_v34 = vpop.f32.mrf.mxu1 }
 0x107   :  { %v202_v37 = vadd.f32 %v201_v33, %v60_v29  ;;  %v212_v38 = vadd.f32 %v211_v34, %v60_v29 }
 0x108   :  { %v203_v41 = vpop.f32.mrf.mxu0  ;;  %v213_v42 = vpop.f32.mrf.mxu1 }
 0x109   :  { %v299_v43 = vpack.c.bf16 %v202_v37, %v198_v35  ;;  %v304_v44 = vpack.c.bf16 %v212_v38, %v208_v36  ;;  %v204_v45 = vadd.f32 %v203_v41, %v64_v30  ;;  %v214_v46 = vadd.f32 %v213_v42, %v64_v30 }
 0x10b   :  { %300 = vst [vmem:[%s473_s3] sm:$0xff] %v299_v43   ;;  %316 = vst [vmem:[%s473_s3 + $0x8] sm:$0xff] %v304_v44   ;;  %v309_v47 = vpack.c.bf16 %v204_v45, %v200_v39  ;;  %v314_v48 = vpack.c.bf16 %v214_v46, %v210_v40 }
 0x10d   :  { %310 = vst [vmem:[%s474_s4] sm:$0xff] %v309_v47   ;;  %317 = vst [vmem:[%s474_s4 + $0x8] sm:$0xff] %v314_v48  }

// kernel: _decoder_core.21
= control target key start
LH: loop header
LB: loop body
LE: loop exit
PB: predicated region body
PF: predicated region fallthrough
CT: control target
= control target key end

     0   :  { %s1013_s15 = smov 0   ;;  %s1015_s16 = smov 0   ;;  %s1127_s0 = inlined_call_operand.vmem [shape: bf16[2,2,16,64], index: 0, kind: input, shape index: {}]   ;;  %s1128_s1 = inlined_call_operand.vmem [shape: bf16[2,2,16,64], index: 1, kind: input, shape index: {}]   ;;  %s1129_s2 = inlined_call_operand.vmem [shape: bf16[2,2,16,64], index: 2, kind: input, shape index: {}]   ;;  %s1130_s3 = inlined_call_operand.vmem [shape: bf16[128,64], index: 3, kind: input, shape index: {}]   ;;  %s1131_s4 = inlined_call_operand.vmem [shape: bf16[2,2,16,64], index: 4, kind: output, shape index: {}]  }
   0x1   :  { %s1017_s17 = smov 0   ;;  %s1019_s18 = smov 0  }
   0x2   :  { %s1021_s19 = smov 0  }
   0x3 LB: > { %s29_s20 = sadd.s32 1, %s973_s17  ;;  %s33_s21 = sadd.s32 1, %s977_s18  ;;  %s981_s19 = sphi %s1021_s19, %s14_s19   ;;  %s977_s18 = sphi %s1019_s18, %s1135_s18   ;;  %s973_s17 = sphi %s1017_s17, %s1134_s17   ;;  %s969_s16 = sphi %s1015_s16, %s1133_s16   ;;  %s965_s15 = sphi %s1013_s15, %s1132_s15  }
   0x4   : > { %p31_p0 = scmp.ge.s32.totalorder %s29_s20, 2  ;;  %p801_p1 = scmp.ge.s32.totalorder %s981_s19, 1 }
   0x5   : > { %p230_p2 = scmp.lt.s32.totalorder %s981_s19, 5 }
   0x6   : > { %s1137_s20 = smov (%p31_p0, %s29_s20), 0  ;;  %s1139_s21 = smov (!%p31_p0, %s33_s21), %s977_s18 }
   0x7   : > { %p231_p3 = pnand %p801_p1, %p230_p2  ;;  %p35_p4 = scmp.ge.s32.totalorder %s1139_s21, 2 }
   0x8   : > { %p291_p5 = scmp.lt.s32.totalorder (!%p231_p3), %s969_s16, 1  ;;  %p293_p6 = scmp.lt.s32.totalorder (!%p231_p3), %s965_s15, 1 }
   0x9   : > { %s1141_s21 = smov (%p35_p4, %s1139_s21), 0  ;;  %234 = sbr.rel (%p231_p3) target bundleno = 1023 (0x3ff), region = 36 }
   0xa   : > { %s985_s27 = smov (!%p231_p3), 256  }
   0xe   : > { %v924_v0 = vld [vmem:[%s1130_s3 + $0x38] sm:$0xff]   ;;  %v983_v1 = vmov 0.0   ;;  %vm405_vm0 = vcmask 523264   ;;  %v925_v3 = vld [vmem:[%s1130_s3 + $0x30] sm:$0xff]   ;;  %vm984_vm1 = vmmov 0   ;;  %s1143_s16 = smov (!%p291_p5, %s969_s16), 1  ;;  %v494_v30 = vlaneseq }
   0xf   : > { %847 = vmatprep.subr.bf16.mxu0 %v983_v1  ;;  %867 = vmatprep.subr.bf16.mxu1 %v983_v1  ;;  %v431_v2 = vsel %vm405_vm0, %v924_v0, 0  ;;  %v428_v4 = vsel %vm405_vm0, %v925_v3, 0  ;;  %s1145_s15 = smov (!%p293_p6, %s965_s15), 1  ;;  %v926_v5 = vld [vmem:[%s1130_s3 + $0x28] sm:$0xff]   ;;  %s803_s28 = sshll.u32 %s1143_s16, 2  ;;  %v927_v7 = vld [vmem:[%s1130_s3 + $0x20] sm:$0xff]  }
  0x10   : > { %848 = vmatpush3.bf16.xpose.msra.mxu0 %v431_v2  ;;  %863 = vmatprep.mubr.msk.bf16.mxu0 %vm984_vm1, %v983_v1  ;;  %s802_s29 = sshll.u32 %s1145_s15, 1  ;;  %v425_v6 = vsel %vm405_vm0, %v926_v5, 0  ;;  %v422_v8 = vsel %vm405_vm0, %v927_v7, 0  ;;  %v928_v9 = vld [vmem:[%s1130_s3 + $0x18] sm:$0xff]   ;;  %v929_v11 = vld [vmem:[%s1130_s3 + $0x10] sm:$0xff]   ;;  %v930_v13 = vld [vmem:[%s1130_s3 + $0x8] sm:$0xff]  }
  0x11   : > { %849 = vmatprep.subr.bf16.mxu0 %v983_v1  ;;  %869 = vmatprep.mubr.msk.bf16.mxu1 %vm984_vm1, %v983_v1  ;;  %s300_s30 = sadd.s32 %s803_s28, %s802_s29  ;;  %v419_v10 = vsel %vm405_vm0, %v928_v9, 0  ;;  %v416_v12 = vsel %vm405_vm0, %v929_v11, 0  ;;  %v413_v14 = vsel %vm405_vm0, %v930_v13, 0  ;;  %v931_v15 = vld [vmem:[%s1130_s3] sm:$0xff]   ;;  %s986_s28 = smov 264   ;;  %v495_v31 = vshrl.u32 %v494_v30, 7 }
  0x12   : > { %s1064_s5 = sshll.u32 %s300_s30, 2  ;;  %v410_v16 = vsel %vm405_vm0, %v931_v15, 0  ;;  %s987_s29 = smov 113   ;;  %v501_v32 = vand.u32 127, %v494_v30  ;;  %vm555_vm3 = vcmask 130048   ;;  %vm637_vm5 = vcmask 519168  }
  0x13   : > { %s302_s8 = scalar_lea.vmem %s1127_s0, %s1064_s5  ;;  %s312_s26 = scalar_lea.vmem %s1128_s1, %s1064_s5  ;;  %v496_v33 = vadd.s32 8, %v495_v31 }
  0x14   : > { %v932_v17 = vld [vmem:[%s302_s8] sm:$0xff]   ;;  %vm502_vm2 = vcmp.le.s32.totalorder %v501_v32, %v495_v31  ;;  %s321_s7 = scalar_lea.vmem %s1129_s2, %s1064_s5  ;;  %s334_s10 = scalar_lea.vmem %s1131_s4, %s1064_s5 }
  0x15   : > { %v933_v18 = vld [vmem:[%s312_s26] sm:$0xff]   ;;  %vm503_vm4 = vcmp.le.s32.totalorder %v501_v32, %v496_v33 }
  0x16   : > { %v512_v19 = vsel %vm405_vm0, %v933_v18, 0  ;;  %v934_v52 = vld [vmem:[%s321_s7] sm:$0xff]  }
  0x17   : > { %868 = vmatpush3.bf16.xpose.msra.mxu1 %v512_v19 }
  0x18   : > { %850 = vmatpush3.bf16.xpose.msra.mxu0 %v428_v4  ;;  %873 = vmatprep.subr.bf16.mxu1 %v983_v1 }
  0x19   : > { %851 = vmatprep.subr.bf16.mxu0 %v983_v1 }
  0x1e   : > { %870 = vmatmul.mubr.msk.bf16.vlgmr.msra.gmra.mxu1 %vm405_vm0, %v932_v17 }
  0x1f   : > { %875 = vmatprep.mubr.msk.bf16.mxu1 %vm984_vm1, %v983_v1  ;;  %874 = vmatpush3.bf16.msra.mxu1 %v934_v52 }
  0x20   : > { %852 = vmatpush3.bf16.xpose.msra.mxu0 %v425_v6 }
  0x21   : > { %853 = vmatprep.subr.bf16.mxu0 %v983_v1 }
  0x28   : > { %854 = vmatpush3.bf16.xpose.msra.mxu0 %v422_v8 }
  0x29   : > { %855 = vmatprep.subr.bf16.mxu0 %v983_v1 }
  0x30   : > { %856 = vmatpush3.bf16.xpose.msra.mxu0 %v419_v10 }
  0x31   : > { %857 = vmatprep.subr.bf16.mxu0 %v983_v1 }
  0x38   : > { %858 = vmatpush3.bf16.xpose.msra.mxu0 %v416_v12 }
  0x39   : > { %859 = vmatprep.subr.bf16.mxu0 %v983_v1 }
  0x40   : > { %860 = vmatpush3.bf16.xpose.msra.mxu0 %v413_v14 }
  0x41   : > { %861 = vmatprep.subr.bf16.mxu0 %v983_v1 }
  0x48   : > { %862 = vmatpush3.bf16.xpose.msra.mxu0 %v410_v16 }
  0x4f   : > { %864 = vmatmul.mubr.msk.bf16.vlgmr.msra.gmra.mxu0 %vm405_vm0, %v932_v17 }
  0xde   : > { %v548_v24 = vpop.f32.mrf.mxu1 }
  0xe0   : > { %v871_v25 = vpop.f32.mrf.mxu1 }
  0xe2   : > { %v551_v26 = vpop.f32.mrf.mxu1 }
  0xe4   : > { %v872_v27 = vpop.f32.mrf.mxu1 }
 0x10f   : > { %v467_v20 = vpop.f32.mrf.mxu0 }
 0x110   : > { %480 = vrot.lane.b32.xlu0 %v467_v20, %s985_s27 }
 0x111   : > { %v865_v21 = vpop.f32.mrf.mxu0 }
 0x113   : > { %v470_v22 = vpop.f32.mrf.mxu0 }
 0x114   : > { %488 = vrot.lane.b32.xlu0 %v470_v22, %s986_s28 }
 0x115   : > { %v866_v23 = vpop.f32.mrf.mxu0 }
 0x182   : > { %v481_v28 = vpop.permute.xlu0 %480 }
 0x183   : > { %490 = vrot.lane.b32.xlu1 %v481_v28, %s987_s29 }
 0x186   : > { %v489_v29 = vpop.permute.xlu0 %488 }
 0x187   : > { %492 = vrot.lane.b32.xlu1 %v489_v29, %s987_s29 }
 0x1f5   : > { %v491_v34 = vpop.permute.xlu1 %490 }
 0x1f6   : > { %v504_v35 = vsel %vm502_vm2, %v491_v34, 0.0 }
 0x1f7   : > { %v549_v36 = vadd.f32 %v548_v24, %v504_v35 }
 0x1f9   : > { %v493_v37 = vpop.permute.xlu1 %492  ;;  %v556_v38 = vsel %vm555_vm3, %v549_v36, -inf }
 0x1fa   : > { %v505_v39 = vsel %vm503_vm4, %v493_v37, 0.0  ;;  %557 = vmax.xlane.f32.xlu0 %v556_v38 }
 0x1fb   : > { %v552_v40 = vadd.f32 %v551_v26, %v505_v39 }
 0x1fd   : > { %v559_v41 = vsel %vm555_vm3, %v552_v40, -inf }
 0x1fe   : > { %560 = vmax.xlane.f32.xlu1 %v559_v41 }
 0x283   : > { %v558_v42 = vpop.xlane.xlu0 %557 }
 0x284   : > { %v562_v43 = vsub.f32 %v549_v36, %v558_v42 }
 0x286   : > { %v564_v44 = vmul.f32 1.442695, %v562_v43 }
 0x287   : > { %v561_v45 = vpop.xlane.xlu1 %560 }
 0x288   : > { %935 = vpow2.f32 %v564_v44  ;;  %v563_v46 = vsub.f32 %v552_v40, %v561_v45 }
 0x28a   : > { %v566_v47 = vmul.f32 1.442695, %v563_v46 }
 0x28c   : > { %937 = vpow2.f32 %v566_v47 }
 0x295   : > { %v936_v48 = vpop.eup %935 }
 0x296   : > { %v568_v49 = vsel %vm555_vm3, %v936_v48, 0.0 }
 0x297   : > { %569 = vadd.xlane.f32.xlu0 %v568_v49 }
 0x299   : > { %v938_v50 = vpop.eup %937 }
 0x29a   : > { %v571_v51 = vsel %vm555_vm3, %v938_v50, 0.0 }
 0x29b   : > { %572 = vadd.xlane.f32.xlu0 %v571_v51 }
 0x320   : > { %v570_v53 = vpop.xlane.xlu0 %569 }
 0x321   : > { %939 = vrcp.f32 %v570_v53 }
 0x324   : > { %v573_v54 = vpop.xlane.xlu0 %572 }
 0x325   : > { %941 = vrcp.f32 %v573_v54 }
 0x32e   : > { %v940_v55 = vpop.eup %939 }
 0x32f   : > { %v576_v58 = vmul.f32 %v940_v55, %v936_v48 }
 0x332   : > { %v942_v56 = vpop.eup %941 }
 0x333   : > { %v577_v57 = vmul.f32 %v942_v56, %v938_v50 }
 0x335   : > { %v578_v59 = vpack.c.bf16 %v577_v57, %v576_v58 }
 0x337   : > { %876 = vmatmul.mubr.msk.bf16.vlgmr.msra.gmra.mxu1 %vm555_vm3, %v578_v59 }
 0x3f7   : > { %v622_v60 = vpop.f32.mrf.mxu1 }
 0x3f8   : > { %v832_v61 = vpack.c.bf16 %v622_v60, %v622_v60 }
 0x3f9   : > { %v877_v62 = vpop.f32.mrf.mxu1 }
 0x3fa   : > { %638 = vst.msk [vmem:[%s334_s10] sm:$0xf] %vm637_vm5, %v832_v61 }
 0x3fb   : > { %v625_v63 = vpop.f32.mrf.mxu1 }
 0x3fc   : > { %v833_v0 = vpack.c.bf16 %v625_v63, %v625_v63 }
 0x3fd   : > { %v878_v1 = vpop.f32.mrf.mxu1 }
 0x3fe   : > { %639 = vst.msk [vmem:[%s334_s10 + $0x4] sm:$0xf] %vm637_vm5, %v833_v0 }
 0x3ff PF: > { %s14_s19 = sadd.s32 1, %s981_s19   ;;  %s1132_s15 = smov %s973_s17 }
 0x400   : > { %p11_p7 = scmp.ge.s32.totalorder %s14_s19, 6   ;;  %s1133_s16 = smov %s977_s18 }
 0x401   : > { %s1134_s17 = smov %s1137_s20  ;;  %s1135_s18 = smov %s1141_s21 }
 0x402   :  { %13 = sbr.rel (!%p11_p7) target bundleno = 3 (0x3), region = 72 }

// kernel: _decoder_core.23
= control target key start
LH: loop header
LB: loop body
LE: loop exit
PB: predicated region body
PF: predicated region fallthrough
CT: control target
= control target key end

     0   :  { %vm190_vm0 = vcmask 523264   ;;  %s581_s1 = inlined_call_operand.vmem [shape: bf16[64,128], index: 1, kind: input, shape index: {}]   ;;  %s582_s0 = inlined_call_operand.vmem [shape: f32[32,128], index: 0, kind: input, shape index: {}]   ;;  %s583_s3 = inlined_call_operand.vmem [shape: bf16[128,64], index: 3, kind: input, shape index: {}]   ;;  %s584_s2 = inlined_call_operand.vmem [shape: f32[1,64], index: 2, kind: input, shape index: {}]   ;;  %s585_s4 = inlined_call_operand.vmem [shape: f32[1,128], index: 4, kind: input, shape index: {}]   ;;  %s586_s5 = inlined_call_operand.vmem [shape: f32[1,128], index: 5, kind: input, shape index: {}]   ;;  %s587_s6 = inlined_call_operand.vmem [shape: f32[1,128], index: 6, kind: input, shape index: {}]   ;;  %s588_s7 = inlined_call_operand.vmem [shape: f32[32,128], index: 7, kind: output, shape index: {}]  }
   0x1   :  { %v423_v0 = vld [vmem:[%s581_s1 + $0x18] sm:$0xff]   ;;  %v424_v1 = vld [vmem:[%s581_s1 + $0x10] sm:$0xff]   ;;  %v492_v2 = vld [vmem:[%s582_s0] sm:$0xff] }
   0x2   :  { %383 = vmatprep.subr.bf16.mxu0 %v423_v0  ;;  %v497_v3 = vld [vmem:[%s582_s0 + $0x8] sm:$0xff]  ;;  %v427_v5 = vld [vmem:[%s583_s3 + $0x38] sm:$0xff]   ;;  %v428_v6 = vld [vmem:[%s583_s3 + $0x30] sm:$0xff]  }
   0x3   :  { %384 = vmatpush3.bf16.xpose.msra.mxu0 %v423_v0  ;;  %v31_v4 = vpack.c.bf16 %v497_v3, %v492_v2  ;;  %v425_v7 = vld [vmem:[%s581_s1 + $0x8] sm:$0xff]   ;;  %415 = vmatprep.subr.msk.bf16.mxu1 %vm190_vm0, %v427_v5  ;;  %v219_v8 = vsel %vm190_vm0, %v427_v5, 0  ;;  %v216_v9 = vsel %vm190_vm0, %v428_v6, 0  ;;  %v426_v11 = vld [vmem:[%s581_s1] sm:$0xff]   ;;  %v29_v14 = vld [vmem:[%s582_s0 + $0x10] sm:$0xff] }
   0x4   :  { %385 = vmatprep.subr.bf16.mxu0 %v424_v1  ;;  %396 = vmatpush3.bf16.xpose.msra.mxu1 %v219_v8  ;;  %v429_v10 = vld [vmem:[%s583_s3 + $0x28] sm:$0xff]   ;;  %v430_v13 = vld [vmem:[%s583_s3 + $0x20] sm:$0xff]   ;;  %v30_v15 = vld [vmem:[%s582_s0 + $0x18] sm:$0xff] }
   0x5   :  { %391 = vmatprep.mubr.bf16.mxu0 %v31_v4  ;;  %416 = vmatprep.subr.msk.bf16.mxu1 %vm190_vm0, %v428_v6  ;;  %v213_v12 = vsel %vm190_vm0, %v429_v10, 0  ;;  %v32_v16 = vpack.c.bf16 %v30_v15, %v29_v14  ;;  %v210_v17 = vsel %vm190_vm0, %v430_v13, 0  ;;  %v431_v18 = vld [vmem:[%s583_s3 + $0x18] sm:$0xff]   ;;  %v432_v20 = vld [vmem:[%s583_s3 + $0x10] sm:$0xff]   ;;  %v433_v22 = vld [vmem:[%s583_s3 + $0x8] sm:$0xff]  }
   0x6   :  { %v207_v19 = vsel %vm190_vm0, %v431_v18, 0  ;;  %v204_v21 = vsel %vm190_vm0, %v432_v20, 0  ;;  %v201_v23 = vsel %vm190_vm0, %v433_v22, 0  ;;  %v434_v24 = vld [vmem:[%s583_s3] sm:$0xff]  }
   0x7   :  { %v198_v25 = vsel %vm190_vm0, %v434_v24, 0  ;;  %v349_v28 = vld [vmem:[%s584_s2] ss:$0 sm:$0xff] }
   0x8   :  { %v354_v41 = vld [vmem:[%s585_s4] ss:$0 sm:$0xff] }
   0xb   :  { %386 = vmatpush3.bf16.xpose.msra.mxu0 %v424_v1 }
   0xc   :  { %387 = vmatprep.subr.bf16.mxu0 %v425_v7  ;;  %398 = vmatpush3.bf16.xpose.msra.mxu1 %v216_v9 }
   0xd   :  { %417 = vmatprep.subr.msk.bf16.mxu1 %vm190_vm0, %v429_v10 }
  0x13   :  { %388 = vmatpush3.bf16.xpose.msra.mxu0 %v425_v7 }
  0x14   :  { %389 = vmatprep.subr.bf16.mxu0 %v426_v11  ;;  %400 = vmatpush3.bf16.xpose.msra.mxu1 %v213_v12 }
  0x15   :  { %418 = vmatprep.subr.msk.bf16.mxu1 %vm190_vm0, %v430_v13 }
  0x1b   :  { %390 = vmatpush3.bf16.xpose.msra.mxu0 %v426_v11 }
  0x1c   :  { %402 = vmatpush3.bf16.xpose.msra.mxu1 %v210_v17 }
  0x1d   :  { %419 = vmatprep.subr.msk.bf16.mxu1 %vm190_vm0, %v431_v18 }
  0x22   :  { %392 = vmatmul.mubr.bf16.vlgmr.msra.gmra.mxu0 %v32_v16 }
  0x24   :  { %404 = vmatpush3.bf16.xpose.msra.mxu1 %v207_v19  ;;  %v365_v19 = vld [vmem:[%s586_s5] ss:$0 sm:$0xff] }
  0x25   :  { %420 = vmatprep.subr.msk.bf16.mxu1 %vm190_vm0, %v432_v20 }
  0x2c   :  { %406 = vmatpush3.bf16.xpose.msra.mxu1 %v204_v21  ;;  %v366_v21 = vld [vmem:[%s587_s6] ss:$0 sm:$0xff] }
  0x2d   :  { %421 = vmatprep.subr.msk.bf16.mxu1 %vm190_vm0, %v433_v22 }
  0x34   :  { %408 = vmatpush3.bf16.xpose.msra.mxu1 %v201_v23 }
  0x35   :  { %422 = vmatprep.subr.msk.bf16.mxu1 %vm190_vm0, %v434_v24 }
  0x3c   :  { %410 = vmatpush3.bf16.xpose.msra.mxu1 %v198_v25 }
  0xe2   :  { %v393_v26 = vpop.f32.mrf.mxu0 }
  0xe3   :  { %v115_v32 = vadd.f32 %v393_v26, %v349_v28 }
  0xe4   :  { %v106_v27 = vpop.f32.mrf.mxu0 }
  0xe5   :  { %v107_v30 = vadd.f32 %v349_v28, %v106_v27  ;;  %v123_v38 = vmax.f32 %v115_v32, 0.0 }
  0xe6   :  { %v394_v29 = vpop.f32.mrf.mxu0 }
  0xe7   :  { %v118_v31 = vadd.f32 %v394_v29, %v349_v28  ;;  %v121_v36 = vmax.f32 %v107_v30, 0.0 }
  0xe8   :  { %v109_v33 = vpop.f32.mrf.mxu0 }
  0xe9   :  { %v110_v34 = vadd.f32 %v349_v28, %v109_v33  ;;  %v124_v35 = vmax.f32 %v118_v31, 0.0 }
  0xeb   :  { %v122_v37 = vmax.f32 %v110_v34, 0.0  ;;  %v126_v40 = vpack.c.bf16 %v124_v35, %v123_v38 }
  0xed   :  { %v125_v39 = vpack.c.bf16 %v122_v37, %v121_v36 }
  0xef   :  { %411 = vmatprep.mubr.msk.bf16.mxu1 %vm190_vm0, %v125_v39 }
  0xf0   :  { %412 = vmatmul.mubr.msk.bf16.vlgmr.msra.gmra.mxu1 %vm190_vm0, %v126_v40 }
 0x1b0   :  { %v413_v42 = vpop.f32.mrf.mxu1 }
 0x1b1   :  { %v264_v43 = vadd.f32 %v413_v42, %v354_v41 }
 0x1b2   :  { %v255_v44 = vpop.f32.mrf.mxu1 }
 0x1b3   :  { %v256_v45 = vadd.f32 %v354_v41, %v255_v44  ;;  %v272_v46 = vadd.f32 %v264_v43, %v29_v14 }
 0x1b4   :  { %v414_v47 = vpop.f32.mrf.mxu1 }
 0x1b5   :  { %v267_v48 = vadd.f32 %v414_v47, %v354_v41  ;;  %280 = vadd.xlane.f32.xlu1 %v272_v46  ;;  %v270_v49 = vadd.f32 %v256_v45, %v492_v2 }
 0x1b6   :  { %v258_v50 = vpop.f32.mrf.mxu1 }
 0x1b7   :  { %v259_v51 = vadd.f32 %v354_v41, %v258_v50  ;;  %276 = vadd.xlane.f32.xlu0 %v270_v49  ;;  %v273_v52 = vadd.f32 %v267_v48, %v30_v15 }
 0x1b9   :  { %282 = vadd.xlane.f32.xlu1 %v273_v52  ;;  %v271_v53 = vadd.f32 %v259_v51, %v497_v3 }
 0x1bb   :  { %278 = vadd.xlane.f32.xlu0 %v271_v53 }
 0x23e   :  { %v281_v54 = vpop.xlane.xlu1 %280 }
 0x23f   :  { %v287_v56 = vmul.f32 0.0078125, %v281_v54 }
 0x240   :  { %v277_v55 = vpop.xlane.xlu0 %276 }
 0x241   :  { %v285_v57 = vmul.f32 0.0078125, %v277_v55  ;;  %v291_v61 = vsub.f32 %v272_v46, %v287_v56 }
 0x242   :  { %v283_v58 = vpop.xlane.xlu1 %282 }
 0x243   :  { %v289_v59 = vsub.f32 %v270_v49, %v285_v57  ;;  %v288_v62 = vmul.f32 0.0078125, %v283_v58  ;;  %v295_v4 = vmul.f32 %v291_v61, %v291_v61 }
 0x244   :  { %v279_v60 = vpop.xlane.xlu0 %278 }
 0x245   :  { %v286_v63 = vmul.f32 0.0078125, %v279_v60  ;;  %v293_v0 = vmul.f32 %v289_v59, %v289_v59  ;;  %v292_v2 = vsub.f32 %v273_v52, %v288_v62 }
 0x247   :  { %v290_v1 = vsub.f32 %v271_v53, %v286_v63  ;;  %297 = vadd.xlane.f32.xlu0 %v293_v0  ;;  %v296_v3 = vmul.f32 %v292_v2, %v292_v2 }
 0x249   :  { %v294_v5 = vmul.f32 %v290_v1, %v290_v1 }
 0x24b   :  { %301 = vadd.xlane.f32.xlu0 %v295_v4  ;;  %299 = vadd.xlane.f32.xlu1 %v294_v5 }
 0x24f   :  { %303 = vadd.xlane.f32.xlu1 %v296_v3 }
 0x2d0   :  { %v298_v6 = vpop.xlane.xlu0 %297 }
 0x2d1   :  { %v305_v7 = vmul.f32 0.0078125, %v298_v6 }
 0x2d3   :  { %v309_v8 = vadd.f32 1e-06, %v305_v7 }
 0x2d4   :  { %v300_v9 = vpop.xlane.xlu1 %299  ;;  %v302_v10 = vpop.xlane.xlu0 %301 }
 0x2d5   :  { %435 = vrsqrt.f32 %v309_v8  ;;  %v306_v11 = vmul.f32 0.0078125, %v300_v9  ;;  %v307_v12 = vmul.f32 0.0078125, %v302_v10 }
 0x2d7   :  { %v310_v13 = vadd.f32 1e-06, %v306_v11  ;;  %v311_v14 = vadd.f32 1e-06, %v307_v12 }
 0x2d8   :  { %v304_v15 = vpop.xlane.xlu1 %303 }
 0x2d9   :  { %437 = vrsqrt.f32 %v310_v13  ;;  %v308_v16 = vmul.f32 0.0078125, %v304_v15 }
 0x2da   :  { %439 = vrsqrt.f32 %v311_v14 }
 0x2db   :  { %v312_v17 = vadd.f32 1e-06, %v308_v16 }
 0x2dd   :  { %441 = vrsqrt.f32 %v312_v17 }
 0x2e2   :  { %v436_v18 = vpop.eup %435 }
 0x2e3   :  { %v317_v20 = vmul.f32 %v436_v18, %v289_v59 }
 0x2e5   :  { %v327_v22 = vmul.f32 %v365_v19, %v317_v20 }
 0x2e6   :  { %v438_v23 = vpop.eup %437 }
 0x2e7   :  { %v440_v24 = vpop.eup %439  ;;  %v337_v25 = vadd.f32 %v366_v21, %v327_v22  ;;  %v318_v26 = vmul.f32 %v438_v23, %v290_v1 }
 0x2e8   :  { %v319_v27 = vmul.f32 %v440_v24, %v291_v61 }
 0x2e9   :  { %341 = vst [vmem:[%s588_s7] sm:$0xff] %v337_v25  ;;  %v328_v28 = vmul.f32 %v365_v19, %v318_v26 }
 0x2ea   :  { %v442_v29 = vpop.eup %441  ;;  %v329_v30 = vmul.f32 %v365_v19, %v319_v27 }
 0x2eb   :  { %v338_v31 = vadd.f32 %v366_v21, %v328_v28  ;;  %v320_v32 = vmul.f32 %v442_v29, %v292_v2 }
 0x2ec   :  { %v339_v33 = vadd.f32 %v366_v21, %v329_v30 }
 0x2ed   :  { %342 = vst [vmem:[%s588_s7 + $0x8] sm:$0xff] %v338_v31  ;;  %v330_v34 = vmul.f32 %v365_v19, %v320_v32 }
 0x2ee   :  { %343 = vst [vmem:[%s588_s7 + $0x10] sm:$0xff] %v339_v33 }
 0x2ef   :  { %v340_v35 = vadd.f32 %v366_v21, %v330_v34 }
 0x2f1   :  { %344 = vst [vmem:[%s588_s7 + $0x18] sm:$0xff] %v340_v35 }

// kernel: _decoder_core.31
= control target key start
LH: loop header
LB: loop body
LE: loop exit
PB: predicated region body
PF: predicated region fallthrough
CT: control target
= control target key end

     0   :  { %vm191_vm0 = vcmask 523264   ;;  %s613_s0 = inlined_call_operand.vmem [shape: f32[32,128], index: 0, kind: input, shape index: {}]   ;;  %s614_s1 = inlined_call_operand.vmem [shape: bf16[64,128], index: 1, kind: input, shape index: {}]   ;;  %s615_s2 = inlined_call_operand.vmem [shape: f32[1,64], index: 2, kind: input, shape index: {}]   ;;  %s616_s3 = inlined_call_operand.vmem [shape: bf16[128,64], index: 3, kind: input, shape index: {}]   ;;  %s617_s4 = inlined_call_operand.vmem [shape: f32[1,128], index: 4, kind: input, shape index: {}]   ;;  %s618_s5 = inlined_call_operand.vmem [shape: f32[1,128], index: 5, kind: input, shape index: {}]   ;;  %s619_s6 = inlined_call_operand.vmem [shape: f32[1,128], index: 6, kind: input, shape index: {}]   ;;  %s620_s7 = inlined_call_operand.hbm [shape: f32[32,128], index: 7, kind: output, shape index: {}]  }
   0x1   :  { %v439_v0 = vld [vmem:[%s614_s1 + $0x18] sm:$0xff]   ;;  %v440_v1 = vld [vmem:[%s614_s1 + $0x10] sm:$0xff]   ;;  %v533_v2 = vld [vmem:[%s613_s0] sm:$0xff] }
   0x2   :  { %396 = vmatprep.subr.bf16.mxu0 %v439_v0  ;;  %v538_v3 = vld [vmem:[%s613_s0 + $0x8] sm:$0xff]  ;;  %v443_v5 = vld [vmem:[%s616_s3 + $0x38] sm:$0xff]   ;;  %v444_v6 = vld [vmem:[%s616_s3 + $0x30] sm:$0xff]  }
   0x3   :  { %397 = vmatpush3.bf16.xpose.msra.mxu0 %v439_v0  ;;  %v32_v4 = vpack.c.bf16 %v538_v3, %v533_v2  ;;  %v441_v7 = vld [vmem:[%s614_s1 + $0x8] sm:$0xff]   ;;  %428 = vmatprep.subr.msk.bf16.mxu1 %vm191_vm0, %v443_v5  ;;  %v220_v8 = vsel %vm191_vm0, %v443_v5, 0 }
   0x4   :  { %398 = vmatprep.subr.bf16.mxu0 %v440_v1  ;;  %409 = vmatpush3.bf16.xpose.msra.mxu1 %v220_v8 }
   0x5   :  { %404 = vmatprep.mubr.bf16.mxu0 %v32_v4  ;;  %429 = vmatprep.subr.msk.bf16.mxu1 %vm191_vm0, %v444_v6 }
   0xb   :  { %399 = vmatpush3.bf16.xpose.msra.mxu0 %v440_v1 }
   0xc   :  { %400 = vmatprep.subr.bf16.mxu0 %v441_v7 }
   0xd   :  { %12 = vsyncpa [#allocation3], 0  ;;  %v217_v9 = vsel %vm191_vm0, %v444_v6, 0  ;;  %v445_v10 = vld [vmem:[%s616_s3 + $0x28] sm:$0xff]   ;;  %v442_v11 = vld [vmem:[%s614_s1] sm:$0xff]   ;;  %s481_s13 = smov [#allocation2]  }
   0xe   :  { %411 = vmatpush3.bf16.xpose.msra.mxu1 %v217_v9  ;;  %v214_v12 = vsel %vm191_vm0, %v445_v10, 0  ;;  %v446_v13 = vld [vmem:[%s616_s3 + $0x20] sm:$0xff]   ;;  %v30_v14 = vld [vmem:[%s613_s0 + $0x10] sm:$0xff]  ;;  %v31_v15 = vld [vmem:[%s613_s0 + $0x18] sm:$0xff] }
   0xf   :  { %430 = vmatprep.subr.msk.bf16.mxu1 %vm191_vm0, %v445_v10  ;;  %v33_v16 = vpack.c.bf16 %v31_v15, %v30_v14  ;;  %v211_v17 = vsel %vm191_vm0, %v446_v13, 0  ;;  %v447_v18 = vld [vmem:[%s616_s3 + $0x18] sm:$0xff]   ;;  %v448_v20 = vld [vmem:[%s616_s3 + $0x10] sm:$0xff]   ;;  %v449_v22 = vld [vmem:[%s616_s3 + $0x8] sm:$0xff]  }
  0x10   :  { %v208_v19 = vsel %vm191_vm0, %v447_v18, 0  ;;  %v205_v21 = vsel %vm191_vm0, %v448_v20, 0  ;;  %v202_v23 = vsel %vm191_vm0, %v449_v22, 0  ;;  %v450_v24 = vld [vmem:[%s616_s3] sm:$0xff]  }
  0x11   :  { %v199_v25 = vsel %vm191_vm0, %v450_v24, 0  ;;  %v362_v28 = vld [vmem:[%s615_s2] ss:$0 sm:$0xff] }
  0x12   :  { %v367_v41 = vld [vmem:[%s617_s4] ss:$0 sm:$0xff] }
  0x13   :  { %401 = vmatpush3.bf16.xpose.msra.mxu0 %v441_v7 }
  0x14   :  { %402 = vmatprep.subr.bf16.mxu0 %v442_v11 }
  0x16   :  { %413 = vmatpush3.bf16.xpose.msra.mxu1 %v214_v12 }
  0x17   :  { %431 = vmatprep.subr.msk.bf16.mxu1 %vm191_vm0, %v446_v13 }
  0x1b   :  { %403 = vmatpush3.bf16.xpose.msra.mxu0 %v442_v11 }
  0x1e   :  { %415 = vmatpush3.bf16.xpose.msra.mxu1 %v211_v17 }
  0x1f   :  { %432 = vmatprep.subr.msk.bf16.mxu1 %vm191_vm0, %v447_v18 }
  0x22   :  { %405 = vmatmul.mubr.bf16.vlgmr.msra.gmra.mxu0 %v33_v16 }
  0x26   :  { %417 = vmatpush3.bf16.xpose.msra.mxu1 %v208_v19  ;;  %v378_v19 = vld [vmem:[%s618_s5] ss:$0 sm:$0xff]  ;;  %s351_s5 = sshll.u32 %s481_s13, 4  ;;  %s352_s5 = int_to_ptr.vmem [resolvable:$true] %s351_s5 }
  0x27   :  { %433 = vmatprep.subr.msk.bf16.mxu1 %vm191_vm0, %v448_v20  ;;  %p464_p1 = scmp.lt.s32.totalorder %s352_s5, %s352_s5 }
  0x2e   :  { %419 = vmatpush3.bf16.xpose.msra.mxu1 %v205_v21  ;;  %v379_v21 = vld [vmem:[%s619_s6] ss:$0 sm:$0xff]  ;;  %s459_s6 = scalar_lea.vmem %s352_s5, 512 }
  0x2f   :  { %434 = vmatprep.subr.msk.bf16.mxu1 %vm191_vm0, %v449_v22  ;;  %p460_p0 = scmp.ne.s32.totalorder %s352_s5, %s459_s6  ;;  %p465_p2 = scmp.lt.s32.totalorder %s459_s6, %s459_s6 }
  0x31   :  { %p466_p3 = por %p465_p2, %p464_p1 }
  0x33   :  { %p467_p4 = pnand %p466_p3, %p460_p0 }
  0x36   :  { %421 = vmatpush3.bf16.xpose.msra.mxu1 %v202_v23 }
  0x37   :  { %435 = vmatprep.subr.msk.bf16.mxu1 %vm191_vm0, %v450_v24 }
  0x3e   :  { %423 = vmatpush3.bf16.xpose.msra.mxu1 %v199_v25 }
  0xe2   :  { %v406_v26 = vpop.f32.mrf.mxu0 }
  0xe3   :  { %v116_v32 = vadd.f32 %v406_v26, %v362_v28 }
  0xe4   :  { %v107_v27 = vpop.f32.mrf.mxu0 }
  0xe5   :  { %v108_v30 = vadd.f32 %v362_v28, %v107_v27  ;;  %v124_v38 = vmax.f32 %v116_v32, 0.0 }
  0xe6   :  { %v407_v29 = vpop.f32.mrf.mxu0 }
  0xe7   :  { %v119_v31 = vadd.f32 %v407_v29, %v362_v28  ;;  %v122_v36 = vmax.f32 %v108_v30, 0.0 }
  0xe8   :  { %v110_v33 = vpop.f32.mrf.mxu0 }
  0xe9   :  { %v111_v34 = vadd.f32 %v362_v28, %v110_v33  ;;  %v125_v35 = vmax.f32 %v119_v31, 0.0 }
  0xeb   :  { %v123_v37 = vmax.f32 %v111_v34, 0.0  ;;  %v127_v40 = vpack.c.bf16 %v125_v35, %v124_v38 }
  0xed   :  { %v126_v39 = vpack.c.bf16 %v123_v37, %v122_v36 }
  0xef   :  { %424 = vmatprep.mubr.msk.bf16.mxu1 %vm191_vm0, %v126_v39 }
  0xf0   :  { %425 = vmatmul.mubr.msk.bf16.vlgmr.msra.gmra.mxu1 %vm191_vm0, %v127_v40 }
 0x1b0   :  { %v426_v42 = vpop.f32.mrf.mxu1 }
 0x1b1   :  { %v265_v43 = vadd.f32 %v426_v42, %v367_v41 }
 0x1b2   :  { %v256_v44 = vpop.f32.mrf.mxu1 }
 0x1b3   :  { %v257_v45 = vadd.f32 %v367_v41, %v256_v44  ;;  %v273_v46 = vadd.f32 %v265_v43, %v30_v14 }
 0x1b4   :  { %v427_v47 = vpop.f32.mrf.mxu1 }
 0x1b5   :  { %v268_v48 = vadd.f32 %v427_v47, %v367_v41  ;;  %281 = vadd.xlane.f32.xlu1 %v273_v46  ;;  %v271_v49 = vadd.f32 %v257_v45, %v533_v2 }
 0x1b6   :  { %v259_v50 = vpop.f32.mrf.mxu1 }
 0x1b7   :  { %v260_v51 = vadd.f32 %v367_v41, %v259_v50  ;;  %277 = vadd.xlane.f32.xlu0 %v271_v49  ;;  %v274_v52 = vadd.f32 %v268_v48, %v31_v15 }
 0x1b9   :  { %283 = vadd.xlane.f32.xlu1 %v274_v52  ;;  %v272_v53 = vadd.f32 %v260_v51, %v538_v3 }
 0x1bb   :  { %279 = vadd.xlane.f32.xlu0 %v272_v53 }
 0x23e   :  { %v282_v54 = vpop.xlane.xlu1 %281 }
 0x23f   :  { %v288_v56 = vmul.f32 0.0078125, %v282_v54 }
 0x240   :  { %v278_v55 = vpop.xlane.xlu0 %277 }
 0x241   :  { %v286_v57 = vmul.f32 0.0078125, %v278_v55  ;;  %v292_v61 = vsub.f32 %v273_v46, %v288_v56 }
 0x242   :  { %v284_v58 = vpop.xlane.xlu1 %283 }
 0x243   :  { %v290_v59 = vsub.f32 %v271_v49, %v286_v57  ;;  %v289_v62 = vmul.f32 0.0078125, %v284_v58  ;;  %v296_v4 = vmul.f32 %v292_v61, %v292_v61 }
 0x244   :  { %v280_v60 = vpop.xlane.xlu0 %279 }
 0x245   :  { %v287_v63 = vmul.f32 0.0078125, %v280_v60  ;;  %v294_v0 = vmul.f32 %v290_v59, %v290_v59  ;;  %v293_v2 = vsub.f32 %v274_v52, %v289_v62 }
 0x247   :  { %v291_v1 = vsub.f32 %v272_v53, %v287_v63  ;;  %298 = vadd.xlane.f32.xlu0 %v294_v0  ;;  %v297_v3 = vmul.f32 %v293_v2, %v293_v2 }
 0x249   :  { %v295_v5 = vmul.f32 %v291_v1, %v291_v1 }
 0x24b   :  { %302 = vadd.xlane.f32.xlu0 %v296_v4  ;;  %300 = vadd.xlane.f32.xlu1 %v295_v5 }
 0x24f   :  { %304 = vadd.xlane.f32.xlu1 %v297_v3 }
 0x2d0   :  { %v299_v6 = vpop.xlane.xlu0 %298 }
 0x2d1   :  { %v306_v7 = vmul.f32 0.0078125, %v299_v6 }
 0x2d3   :  { %v310_v8 = vadd.f32 1e-06, %v306_v7 }
 0x2d4   :  { %v301_v9 = vpop.xlane.xlu1 %300  ;;  %v303_v10 = vpop.xlane.xlu0 %302 }
 0x2d5   :  { %451 = vrsqrt.f32 %v310_v8  ;;  %v307_v11 = vmul.f32 0.0078125, %v301_v9  ;;  %v308_v12 = vmul.f32 0.0078125, %v303_v10 }
 0x2d7   :  { %v311_v13 = vadd.f32 1e-06, %v307_v11  ;;  %v312_v14 = vadd.f32 1e-06, %v308_v12 }
 0x2d8   :  { %v305_v15 = vpop.xlane.xlu1 %304 }
 0x2d9   :  { %453 = vrsqrt.f32 %v311_v13  ;;  %v309_v16 = vmul.f32 0.0078125, %v305_v15 }
 0x2da   :  { %455 = vrsqrt.f32 %v312_v14 }
 0x2db   :  { %v313_v17 = vadd.f32 1e-06, %v309_v16 }
 0x2dd   :  { %457 = vrsqrt.f32 %v313_v17 }
 0x2e2   :  { %v452_v18 = vpop.eup %451 }
 0x2e3   :  { %v318_v20 = vmul.f32 %v452_v18, %v290_v59 }
 0x2e5   :  { %v328_v22 = vmul.f32 %v378_v19, %v318_v20 }
 0x2e6   :  { %v454_v23 = vpop.eup %453 }
 0x2e7   :  { %v456_v24 = vpop.eup %455  ;;  %v319_v25 = vmul.f32 %v454_v23, %v291_v1  ;;  %v338_v26 = vadd.f32 %v379_v21, %v328_v22 }
 0x2e8   :  { %v320_v27 = vmul.f32 %v456_v24, %v292_v61 }
 0x2e9   :  { %v329_v28 = vmul.f32 %v378_v19, %v319_v25  ;;  %342 = vst [vmem:[#allocation2] sm:$0xff] %v338_v26 }
 0x2ea   :  { %v458_v29 = vpop.eup %457  ;;  %v330_v30 = vmul.f32 %v378_v19, %v320_v27 }
 0x2eb   :  { %v321_v31 = vmul.f32 %v458_v29, %v293_v2  ;;  %v339_v32 = vadd.f32 %v379_v21, %v329_v28 }
 0x2ec   :  { %v340_v33 = vadd.f32 %v379_v21, %v330_v30 }
 0x2ed   :  { %v331_v34 = vmul.f32 %v378_v19, %v321_v31  ;;  %343 = vst [vmem:[#allocation2 + $0x8] sm:$0xff] %v339_v32 }
 0x2ee   :  { %344 = vst [vmem:[#allocation2 + $0x10] sm:$0xff] %v340_v33 }
 0x2ef   :  { %v341_v35 = vadd.f32 %v379_v21, %v331_v34 }
 0x2f1   :  { %345 = vst [vmem:[#allocation2 + $0x18] sm:$0xff] %v341_v35 }
 0x2f2   :  { %470 = shalt.err (!%p467_p4)
}
 0x2f3   :  { %s482_s14 = smov 128   ;;  %s483_s15 = smov 8  }
 0x2f4   :  { %357 = dma.vmem_to_hbm [thread:$0]  %s352_s5, 512, %s620_s7, [#allocation3], %s482_s14, %s482_s14, %s483_s15  }
 0x2f5   :  { %479 = dma.done.wait [#allocation3], 512  }
 0x2f6   :  { %480 = vsyncadd [#allocation3], 4294966784 }
 0x2f7   :  { %361 = vsyncpa [#allocation3], 1 }

</bundles_post_ra>
